<compile_context>
chip_gen: v5e
topology: v5e:2x2
jax: 0.10.0
libtpu: 0.0.40
codegen_flags: <defaults>
</compile_context>

<pallas_src>
import math

import jax
import jax.numpy as jnp
from jax.experimental import pallas as pl
from jax.experimental.pallas import tpu as pltpu


def _bert_embedding_kernel(ids_ref,        # SMEM (B, S) int32 token ids (scalar prefetch)
                           pe_ref,         # VMEM (TS, E) positional block for this st
                           segid_ref,      # VMEM (1, TS, NSEG_PAD) lane-replicated segment ids
                           segtab_ref,     # VMEM (NSEG_PAD, E) resident segment table
                           tok_hbm,        # HBM  (V, E) token table (pl.ANY)
                           out_ref,        # VMEM (1, TS, E) output block
                           tok_buf,        # VMEM (2, TS, E) double-buffered gathered rows
                           sem):           # DMA semaphores (2,) — one per slot
    st = pl.program_id(0)
    b = pl.program_id(1)
    nb = pl.num_programs(1)
    ts = tok_buf.shape[1]                  # static sequence-tile size
    s0 = st * ts
    slot = b % 2                           # slot consumed by this step

    def issue(batch, slot_idx):
        # Issue all TS row-gather DMAs for `batch` into slot `slot_idx`.
        # ts is small & static -> Python loop unrolls at trace time, and all
        # row copies overlap each other (single shared semaphore per slot).
        for t in range(ts):
            tok_id = ids_ref[batch, s0 + t]
            pltpu.make_async_copy(tok_hbm.at[tok_id],
                                  tok_buf.at[slot_idx, t],
                                  sem.at[slot_idx]).start()

    # Prime the pipeline at the start of each batch row (b == 0).  This runs on
    # whichever core owns this st row, so it is safe under megacore splitting of
    # the outer ("parallel") axis.
    @pl.when(b == 0)
    def _():
        issue(0, 0)

    # Prefetch the NEXT batch's token rows into the other slot before waiting on
    # the current slot, so its gather overlaps this step's wait + compute +
    # output writeback.  (The other slot's data was consumed last step.)
    @pl.when(b + 1 < nb)
    def _():
        issue(b + 1, 1 - slot)

    # ONE aggregate wait: the completion amounts of the TS row copies into this
    # slot sum to exactly one (TS, E) transfer, so a single descriptor-sized
    # wait retires them all (no per-row waits).
    pltpu.make_async_copy(tok_hbm.at[pl.ds(0, ts)],
                          tok_buf.at[slot],
                          sem.at[slot]).wait()

    # Segment gather in VMEM: one-hot (TS, NSEG_PAD) @ resident (NSEG_PAD, E)
    # table on the otherwise-idle MXU.  Exact because each one-hot row has a
    # single 1.0 and accumulation is f32.
    seg_ids = segid_ref[0]                                        # (TS, NSEG_PAD) int32
    lane_iota = jax.lax.broadcasted_iota(jnp.int32, seg_ids.shape, 1)
    onehot = (seg_ids == lane_iota).astype(jnp.float32)
    seg_rows = jnp.dot(onehot, segtab_ref[...],
                       preferred_element_type=jnp.float32)        # (TS, E)

    # 3-way add on the VPU; lane-dense (E % 128 == 0), sublane-dense (TS % 8 == 0) store.
    out_ref[0, :, :] = tok_buf[slot] + seg_rows + pe_ref[...]


def bert_embedding_forward(sequence, segment_label, token_table, segment_table,
                           pe_table, *, seq_tile=256):
    """sequence, segment_label: [B, S] int; returns [B, S, E] float32."""
    B, S = sequence.shape
    V, E = token_table.shape
    NSEG = segment_table.shape[0]
    L = pe_table.shape[0]

    TS = min(seq_tile, S)
    assert S % TS == 0 and TS % 8 == 0, "sequence tile must divide S and be a multiple of 8"
    assert E % 128 == 0, "embed dim should be a multiple of 128 for lane-dense stores"
    assert S <= L and L % TS == 0, "positional table must cover S and tile evenly"

    # Pad the tiny segment table's row count to a multiple of 8 so the resident
    # VMEM block and the one-hot contraction dim are sublane-aligned.
    nseg_pad = ((NSEG + 7) // 8) * 8
    seg_tab = jnp.pad(segment_table.astype(jnp.float32),
                      ((0, nseg_pad - NSEG), (0, 0)))

    # Lane-replicate the segment ids so each (1, TS, nseg_pad) block compares
    # directly against a lane-iota in the kernel (no cross-lane broadcast needed).
    seg_ids_b = jnp.broadcast_to(
        segment_label.astype(jnp.int32)[:, :, None], (B, S, nseg_pad))

    # NOTE: the scalar-prefetched (B, S) int32 id array pads in SMEM to
    # [ceil(B/8)*8, ceil(S/128)*128] words — keep S a multiple of 128 (or chunk)
    # for very large batch*seq.
    ids = sequence.astype(jnp.int32)

    NS = S // TS
    return pl.pallas_call(
        _bert_embedding_kernel,
        out_shape=jax.ShapeDtypeStruct((B, S, E), jnp.float32),
        grid_spec=pltpu.PrefetchScalarGridSpec(
            num_scalar_prefetch=1,                 # token ids -> SMEM
            grid=(NS, B),                          # st outer (parallel), b inner (carries slots)
            in_specs=[
                # positional rows: index only depends on st (outer axis), so the
                # (TS, E) slab is fetched once per distinct tile, not per batch.
                pl.BlockSpec((TS, E), lambda st, b, ids_s: (st, 0)),
                # lane-replicated segment ids for this (b, st) tile
                pl.BlockSpec((1, TS, nseg_pad), lambda st, b, ids_s: (b, st, 0)),
                # tiny segment table: constant block index -> fetched once, resident
                pl.BlockSpec((nseg_pad, E), lambda st, b, ids_s: (0, 0)),
                # token table stays in HBM; kernel DMAs only the needed rows
                pl.BlockSpec(memory_space=pl.ANY),
            ],
            out_specs=pl.BlockSpec((1, TS, E), lambda st, b, ids_s: (b, st, 0)),
            scratch_shapes=[
                pltpu.VMEM((2, TS, E), jnp.float32),   # double-buffered token rows
                pltpu.SemaphoreType.DMA((2,)),         # one DMA sem per slot
            ]),
        compiler_params=pltpu.CompilerParams(
            dimension_semantics=("parallel", "arbitrary"),
            vmem_limit_bytes=32 * 1024 * 1024),
    )(ids, pe_table.astype(jnp.float32), seg_ids_b, seg_tab,
      token_table.astype(jnp.float32))


def make_positional_table(max_len, d_model):
    position = jnp.arange(max_len, dtype=jnp.float32)[:, None]            # (L, 1)
    div_term = jnp.exp(jnp.arange(0, d_model, 2, dtype=jnp.float32) *
                       (-(math.log(10000.0) / d_model)))                  # (E/2,)
    pe = jnp.zeros((max_len, d_model), dtype=jnp.float32)
    pe = pe.at[:, 0::2].set(jnp.sin(position * div_term))
    pe = pe.at[:, 1::2].set(jnp.cos(position * div_term))
    return pe


if __name__ == "__main__":
    # Small, module-consistent shapes: batch=2, seq=8, embed=128 (multiple of 128
    # for lane density), vocab=64, segment vocab=17 (as in the module).
    B, S, E = 2, 8, 128
    VOCAB = 64
    SEG_VOCAB = 17

    key = jax.random.PRNGKey(0)
    k_tok, k_seg, k_seqi, k_segi = jax.random.split(key, 4)

    # Deterministic "weights" (synthetic init), padding_idx=0 -> zero row 0.
    token_table = jax.random.normal(k_tok, (VOCAB, E), dtype=jnp.float32)
    token_table = token_table.at[0, :].set(0.0)
    segment_table = jax.random.normal(k_seg, (SEG_VOCAB, E), dtype=jnp.float32)
    segment_table = segment_table.at[0, :].set(0.0)

    pe_table = make_positional_table(4096, E)

    # Deterministic example inputs.
    sequence = jax.random.randint(k_seqi, (B, S), 0, VOCAB, dtype=jnp.int32)
    segment_label = jax.random.randint(k_segi, (B, S), 0, 3, dtype=jnp.int32)

    out = bert_embedding_forward(sequence, segment_label, token_table,
                                 segment_table, pe_table)
    out = jax.block_until_ready(out)

    # Reference check in plain JAX (same math, no Pallas).
    ref = (token_table[sequence] + pe_table[None, :S, :]
           + segment_table[segment_label])
    assert out.shape == (B, S, E)
    assert jnp.allclose(out, ref, atol=1e-5), "mismatch vs reference"

    print("KERNEL_OK")
</pallas_src>

<mosaic_0001>
module attributes {stable_mosaic.version = 11 : i64} {
  func.func @_bert_embedding_kernel(%arg0: i32, %arg1: i32, %arg2: memref<2x8xi32, #tpu.memory_space<smem>>, %arg3: memref<8x128xf32, #tpu.memory_space<vmem>>, %arg4: memref<1x8x24xi32, #tpu.memory_space<vmem>>, %arg5: memref<24x128xf32, #tpu.memory_space<vmem>>, %arg6: memref<64x128xf32, #tpu.memory_space<any>>, %arg7: memref<1x8x128xf32, #tpu.memory_space<vmem>>, %arg8: memref<2x8x128xf32, #tpu.memory_space<vmem>>, %arg9: memref<2x!tpu.dma_semaphore, #tpu.memory_space<semaphore_mem>>) attributes {dimension_semantics = [#tpu.dimension_semantics<parallel>, #tpu.dimension_semantics<arbitrary>], iteration_bounds = array<i64: 1, 2>, scalar_prefetch = 1 : i64, scratch_operands = 2 : i64, tpu.core_type = #tpu.core_type<tc>, window_params = [{transform_indices = @transform_0, window_bounds = array<i64: 8, 128>}, {transform_indices = @transform_1, window_bounds = array<i64: 1, 8, 24>}, {pipeline_mode = #tpu.pipeline_mode<synchronous>, transform_indices = @transform_2, window_bounds = array<i64: 24, 128>}, {}, {transform_indices = @transform_4, window_bounds = array<i64: 1, 8, 128>}]} {
    %c8_i32 = arith.constant 8 : i32
    %0 = arith.muli %arg0, %c8_i32 : i32
    %c2_i32 = arith.constant 2 : i32
    %c0_i32 = arith.constant 0 : i32
    %1 = arith.cmpi eq, %c2_i32, %c0_i32 : i32
    %c1_i32 = arith.constant 1 : i32
    %2 = arith.select %1, %c1_i32, %c2_i32 : i32
    %3 = arith.remsi %arg1, %2 : i32
    %c0_i32_0 = arith.constant 0 : i32
    %4 = arith.cmpi ne, %3, %c0_i32_0 : i32
    %c0_i32_1 = arith.constant 0 : i32
    %5 = arith.cmpi slt, %3, %c0_i32_1 : i32
    %c0_i32_2 = arith.constant 0 : i32
    %6 = arith.cmpi slt, %2, %c0_i32_2 : i32
    %7 = arith.xori %5, %6 : i1
    %8 = arith.andi %7, %4 : i1
    %9 = arith.addi %3, %2 : i32
    %10 = arith.select %8, %9, %3 : i32
    %c0_i32_3 = arith.constant 0 : i32
    %11 = arith.cmpi eq, %arg1, %c0_i32_3 : i32
    %12 = arith.extui %11 : i1 to i32
    %c0_i32_4 = arith.constant 0 : i32
    %13 = arith.cmpi ne, %12, %c0_i32_4 : i32
    scf.if %13 {
      %c0_i32_23 = arith.constant 0 : i32
      %40 = arith.addi %0, %c0_i32_23 : i32
      %c0_24 = arith.constant 0 : index
      %41 = arith.index_cast %40 : i32 to index
      %42 = memref.load %arg2[%c0_24, %41] : memref<2x8xi32, #tpu.memory_space<smem>>
      %c0_i32_25 = arith.constant 0 : i32
      %c0_i32_26 = arith.constant 0 : i32
      %c0_i32_27 = arith.constant 0 : i32
      %c0_i32_28 = arith.constant 0 : i32
      %43 = tpu.memref_slice %arg6[%42, %c0_i32_28] : memref<64x128xf32, #tpu.memory_space<any>> -> memref<1x128xf32, #tpu.memory_space<any>>
      %44 = tpu.memref_squeeze %43 : memref<1x128xf32, #tpu.memory_space<any>> -> memref<128xf32, #tpu.memory_space<any>>
      %c0_i32_29 = arith.constant 0 : i32
      %45 = tpu.memref_slice %arg8[%c0_i32_25, %c0_i32_26, %c0_i32_29] : memref<2x8x128xf32, #tpu.memory_space<vmem>> -> memref<1x1x128xf32, #tpu.memory_space<vmem>>
      %46 = tpu.memref_squeeze %45 : memref<1x1x128xf32, #tpu.memory_space<vmem>> -> memref<128xf32, #tpu.memory_space<vmem>>
      %47 = tpu.memref_slice %arg9[%c0_i32_27] : memref<2x!tpu.dma_semaphore, #tpu.memory_space<semaphore_mem>> -> memref<1x!tpu.dma_semaphore, #tpu.memory_space<semaphore_mem>>
      %48 = tpu.memref_squeeze %47 : memref<1x!tpu.dma_semaphore, #tpu.memory_space<semaphore_mem>> -> memref<!tpu.dma_semaphore, #tpu.memory_space<semaphore_mem>>
      tpu.enqueue_dma source(%44 : memref<128xf32, #tpu.memory_space<any>>) target(%46 : memref<128xf32, #tpu.memory_space<vmem>>) target_semaphore(%48 : memref<!tpu.dma_semaphore, #tpu.memory_space<semaphore_mem>>)
      %c1_i32_30 = arith.constant 1 : i32
      %49 = arith.addi %0, %c1_i32_30 : i32
      %c0_31 = arith.constant 0 : index
      %50 = arith.index_cast %49 : i32 to index
      %51 = memref.load %arg2[%c0_31, %50] : memref<2x8xi32, #tpu.memory_space<smem>>
      %c0_i32_32 = arith.constant 0 : i32
      %c1_i32_33 = arith.constant 1 : i32
      %c0_i32_34 = arith.constant 0 : i32
      %c0_i32_35 = arith.constant 0 : i32
      %52 = tpu.memref_slice %arg6[%51, %c0_i32_35] : memref<64x128xf32, #tpu.memory_space<any>> -> memref<1x128xf32, #tpu.memory_space<any>>
      %53 = tpu.memref_squeeze %52 : memref<1x128xf32, #tpu.memory_space<any>> -> memref<128xf32, #tpu.memory_space<any>>
      %c0_i32_36 = arith.constant 0 : i32
      %54 = tpu.memref_slice %arg8[%c0_i32_32, %c1_i32_33, %c0_i32_36] : memref<2x8x128xf32, #tpu.memory_space<vmem>> -> memref<1x1x128xf32, #tpu.memory_space<vmem>>
      %55 = tpu.memref_squeeze %54 : memref<1x1x128xf32, #tpu.memory_space<vmem>> -> memref<128xf32, #tpu.memory_space<vmem>>
      %56 = tpu.memref_slice %arg9[%c0_i32_34] : memref<2x!tpu.dma_semaphore, #tpu.memory_space<semaphore_mem>> -> memref<1x!tpu.dma_semaphore, #tpu.memory_space<semaphore_mem>>
      %57 = tpu.memref_squeeze %56 : memref<1x!tpu.dma_semaphore, #tpu.memory_space<semaphore_mem>> -> memref<!tpu.dma_semaphore, #tpu.memory_space<semaphore_mem>>
      tpu.enqueue_dma source(%53 : memref<128xf32, #tpu.memory_space<any>>) target(%55 : memref<128xf32, #tpu.memory_space<vmem>>) target_semaphore(%57 : memref<!tpu.dma_semaphore, #tpu.memory_space<semaphore_mem>>)
      %c2_i32_37 = arith.constant 2 : i32
      %58 = arith.addi %0, %c2_i32_37 : i32
      %c0_38 = arith.constant 0 : index
      %59 = arith.index_cast %58 : i32 to index
      %60 = memref.load %arg2[%c0_38, %59] : memref<2x8xi32, #tpu.memory_space<smem>>
      %c0_i32_39 = arith.constant 0 : i32
      %c2_i32_40 = arith.constant 2 : i32
      %c0_i32_41 = arith.constant 0 : i32
      %c0_i32_42 = arith.constant 0 : i32
      %61 = tpu.memref_slice %arg6[%60, %c0_i32_42] : memref<64x128xf32, #tpu.memory_space<any>> -> memref<1x128xf32, #tpu.memory_space<any>>
      %62 = tpu.memref_squeeze %61 : memref<1x128xf32, #tpu.memory_space<any>> -> memref<128xf32, #tpu.memory_space<any>>
      %c0_i32_43 = arith.constant 0 : i32
      %63 = tpu.memref_slice %arg8[%c0_i32_39, %c2_i32_40, %c0_i32_43] : memref<2x8x128xf32, #tpu.memory_space<vmem>> -> memref<1x1x128xf32, #tpu.memory_space<vmem>>
      %64 = tpu.memref_squeeze %63 : memref<1x1x128xf32, #tpu.memory_space<vmem>> -> memref<128xf32, #tpu.memory_space<vmem>>
      %65 = tpu.memref_slice %arg9[%c0_i32_41] : memref<2x!tpu.dma_semaphore, #tpu.memory_space<semaphore_mem>> -> memref<1x!tpu.dma_semaphore, #tpu.memory_space<semaphore_mem>>
      %66 = tpu.memref_squeeze %65 : memref<1x!tpu.dma_semaphore, #tpu.memory_space<semaphore_mem>> -> memref<!tpu.dma_semaphore, #tpu.memory_space<semaphore_mem>>
      tpu.enqueue_dma source(%62 : memref<128xf32, #tpu.memory_space<any>>) target(%64 : memref<128xf32, #tpu.memory_space<vmem>>) target_semaphore(%66 : memref<!tpu.dma_semaphore, #tpu.memory_space<semaphore_mem>>)
      %c3_i32 = arith.constant 3 : i32
      %67 = arith.addi %0, %c3_i32 : i32
      %c0_44 = arith.constant 0 : index
      %68 = arith.index_cast %67 : i32 to index
      %69 = memref.load %arg2[%c0_44, %68] : memref<2x8xi32, #tpu.memory_space<smem>>
      %c0_i32_45 = arith.constant 0 : i32
      %c3_i32_46 = arith.constant 3 : i32
      %c0_i32_47 = arith.constant 0 : i32
      %c0_i32_48 = arith.constant 0 : i32
      %70 = tpu.memref_slice %arg6[%69, %c0_i32_48] : memref<64x128xf32, #tpu.memory_space<any>> -> memref<1x128xf32, #tpu.memory_space<any>>
      %71 = tpu.memref_squeeze %70 : memref<1x128xf32, #tpu.memory_space<any>> -> memref<128xf32, #tpu.memory_space<any>>
      %c0_i32_49 = arith.constant 0 : i32
      %72 = tpu.memref_slice %arg8[%c0_i32_45, %c3_i32_46, %c0_i32_49] : memref<2x8x128xf32, #tpu.memory_space<vmem>> -> memref<1x1x128xf32, #tpu.memory_space<vmem>>
      %73 = tpu.memref_squeeze %72 : memref<1x1x128xf32, #tpu.memory_space<vmem>> -> memref<128xf32, #tpu.memory_space<vmem>>
      %74 = tpu.memref_slice %arg9[%c0_i32_47] : memref<2x!tpu.dma_semaphore, #tpu.memory_space<semaphore_mem>> -> memref<1x!tpu.dma_semaphore, #tpu.memory_space<semaphore_mem>>
      %75 = tpu.memref_squeeze %74 : memref<1x!tpu.dma_semaphore, #tpu.memory_space<semaphore_mem>> -> memref<!tpu.dma_semaphore, #tpu.memory_space<semaphore_mem>>
      tpu.enqueue_dma source(%71 : memref<128xf32, #tpu.memory_space<any>>) target(%73 : memref<128xf32, #tpu.memory_space<vmem>>) target_semaphore(%75 : memref<!tpu.dma_semaphore, #tpu.memory_space<semaphore_mem>>)
      %c4_i32 = arith.constant 4 : i32
      %76 = arith.addi %0, %c4_i32 : i32
      %c0_50 = arith.constant 0 : index
      %77 = arith.index_cast %76 : i32 to index
      %78 = memref.load %arg2[%c0_50, %77] : memref<2x8xi32, #tpu.memory_space<smem>>
      %c0_i32_51 = arith.constant 0 : i32
      %c4_i32_52 = arith.constant 4 : i32
      %c0_i32_53 = arith.constant 0 : i32
      %c0_i32_54 = arith.constant 0 : i32
      %79 = tpu.memref_slice %arg6[%78, %c0_i32_54] : memref<64x128xf32, #tpu.memory_space<any>> -> memref<1x128xf32, #tpu.memory_space<any>>
      %80 = tpu.memref_squeeze %79 : memref<1x128xf32, #tpu.memory_space<any>> -> memref<128xf32, #tpu.memory_space<any>>
      %c0_i32_55 = arith.constant 0 : i32
      %81 = tpu.memref_slice %arg8[%c0_i32_51, %c4_i32_52, %c0_i32_55] : memref<2x8x128xf32, #tpu.memory_space<vmem>> -> memref<1x1x128xf32, #tpu.memory_space<vmem>>
      %82 = tpu.memref_squeeze %81 : memref<1x1x128xf32, #tpu.memory_space<vmem>> -> memref<128xf32, #tpu.memory_space<vmem>>
      %83 = tpu.memref_slice %arg9[%c0_i32_53] : memref<2x!tpu.dma_semaphore, #tpu.memory_space<semaphore_mem>> -> memref<1x!tpu.dma_semaphore, #tpu.memory_space<semaphore_mem>>
      %84 = tpu.memref_squeeze %83 : memref<1x!tpu.dma_semaphore, #tpu.memory_space<semaphore_mem>> -> memref<!tpu.dma_semaphore, #tpu.memory_space<semaphore_mem>>
      tpu.enqueue_dma source(%80 : memref<128xf32, #tpu.memory_space<any>>) target(%82 : memref<128xf32, #tpu.memory_space<vmem>>) target_semaphore(%84 : memref<!tpu.dma_semaphore, #tpu.memory_space<semaphore_mem>>)
      %c5_i32 = arith.constant 5 : i32
      %85 = arith.addi %0, %c5_i32 : i32
      %c0_56 = arith.constant 0 : index
      %86 = arith.index_cast %85 : i32 to index
      %87 = memref.load %arg2[%c0_56, %86] : memref<2x8xi32, #tpu.memory_space<smem>>
      %c0_i32_57 = arith.constant 0 : i32
      %c5_i32_58 = arith.constant 5 : i32
      %c0_i32_59 = arith.constant 0 : i32
      %c0_i32_60 = arith.constant 0 : i32
      %88 = tpu.memref_slice %arg6[%87, %c0_i32_60] : memref<64x128xf32, #tpu.memory_space<any>> -> memref<1x128xf32, #tpu.memory_space<any>>
      %89 = tpu.memref_squeeze %88 : memref<1x128xf32, #tpu.memory_space<any>> -> memref<128xf32, #tpu.memory_space<any>>
      %c0_i32_61 = arith.constant 0 : i32
      %90 = tpu.memref_slice %arg8[%c0_i32_57, %c5_i32_58, %c0_i32_61] : memref<2x8x128xf32, #tpu.memory_space<vmem>> -> memref<1x1x128xf32, #tpu.memory_space<vmem>>
      %91 = tpu.memref_squeeze %90 : memref<1x1x128xf32, #tpu.memory_space<vmem>> -> memref<128xf32, #tpu.memory_space<vmem>>
      %92 = tpu.memref_slice %arg9[%c0_i32_59] : memref<2x!tpu.dma_semaphore, #tpu.memory_space<semaphore_mem>> -> memref<1x!tpu.dma_semaphore, #tpu.memory_space<semaphore_mem>>
      %93 = tpu.memref_squeeze %92 : memref<1x!tpu.dma_semaphore, #tpu.memory_space<semaphore_mem>> -> memref<!tpu.dma_semaphore, #tpu.memory_space<semaphore_mem>>
      tpu.enqueue_dma source(%89 : memref<128xf32, #tpu.memory_space<any>>) target(%91 : memref<128xf32, #tpu.memory_space<vmem>>) target_semaphore(%93 : memref<!tpu.dma_semaphore, #tpu.memory_space<semaphore_mem>>)
      %c6_i32 = arith.constant 6 : i32
      %94 = arith.addi %0, %c6_i32 : i32
      %c0_62 = arith.constant 0 : index
      %95 = arith.index_cast %94 : i32 to index
      %96 = memref.load %arg2[%c0_62, %95] : memref<2x8xi32, #tpu.memory_space<smem>>
      %c0_i32_63 = arith.constant 0 : i32
      %c6_i32_64 = arith.constant 6 : i32
      %c0_i32_65 = arith.constant 0 : i32
      %c0_i32_66 = arith.constant 0 : i32
      %97 = tpu.memref_slice %arg6[%96, %c0_i32_66] : memref<64x128xf32, #tpu.memory_space<any>> -> memref<1x128xf32, #tpu.memory_space<any>>
      %98 = tpu.memref_squeeze %97 : memref<1x128xf32, #tpu.memory_space<any>> -> memref<128xf32, #tpu.memory_space<any>>
      %c0_i32_67 = arith.constant 0 : i32
      %99 = tpu.memref_slice %arg8[%c0_i32_63, %c6_i32_64, %c0_i32_67] : memref<2x8x128xf32, #tpu.memory_space<vmem>> -> memref<1x1x128xf32, #tpu.memory_space<vmem>>
      %100 = tpu.memref_squeeze %99 : memref<1x1x128xf32, #tpu.memory_space<vmem>> -> memref<128xf32, #tpu.memory_space<vmem>>
      %101 = tpu.memref_slice %arg9[%c0_i32_65] : memref<2x!tpu.dma_semaphore, #tpu.memory_space<semaphore_mem>> -> memref<1x!tpu.dma_semaphore, #tpu.memory_space<semaphore_mem>>
      %102 = tpu.memref_squeeze %101 : memref<1x!tpu.dma_semaphore, #tpu.memory_space<semaphore_mem>> -> memref<!tpu.dma_semaphore, #tpu.memory_space<semaphore_mem>>
      tpu.enqueue_dma source(%98 : memref<128xf32, #tpu.memory_space<any>>) target(%100 : memref<128xf32, #tpu.memory_space<vmem>>) target_semaphore(%102 : memref<!tpu.dma_semaphore, #tpu.memory_space<semaphore_mem>>)
      %c7_i32 = arith.constant 7 : i32
      %103 = arith.addi %0, %c7_i32 : i32
      %c0_68 = arith.constant 0 : index
      %104 = arith.index_cast %103 : i32 to index
      %105 = memref.load %arg2[%c0_68, %104] : memref<2x8xi32, #tpu.memory_space<smem>>
      %c0_i32_69 = arith.constant 0 : i32
      %c7_i32_70 = arith.constant 7 : i32
      %c0_i32_71 = arith.constant 0 : i32
      %c0_i32_72 = arith.constant 0 : i32
      %106 = tpu.memref_slice %arg6[%105, %c0_i32_72] : memref<64x128xf32, #tpu.memory_space<any>> -> memref<1x128xf32, #tpu.memory_space<any>>
      %107 = tpu.memref_squeeze %106 : memref<1x128xf32, #tpu.memory_space<any>> -> memref<128xf32, #tpu.memory_space<any>>
      %c0_i32_73 = arith.constant 0 : i32
      %108 = tpu.memref_slice %arg8[%c0_i32_69, %c7_i32_70, %c0_i32_73] : memref<2x8x128xf32, #tpu.memory_space<vmem>> -> memref<1x1x128xf32, #tpu.memory_space<vmem>>
      %109 = tpu.memref_squeeze %108 : memref<1x1x128xf32, #tpu.memory_space<vmem>> -> memref<128xf32, #tpu.memory_space<vmem>>
      %110 = tpu.memref_slice %arg9[%c0_i32_71] : memref<2x!tpu.dma_semaphore, #tpu.memory_space<semaphore_mem>> -> memref<1x!tpu.dma_semaphore, #tpu.memory_space<semaphore_mem>>
      %111 = tpu.memref_squeeze %110 : memref<1x!tpu.dma_semaphore, #tpu.memory_space<semaphore_mem>> -> memref<!tpu.dma_semaphore, #tpu.memory_space<semaphore_mem>>
      tpu.enqueue_dma source(%107 : memref<128xf32, #tpu.memory_space<any>>) target(%109 : memref<128xf32, #tpu.memory_space<vmem>>) target_semaphore(%111 : memref<!tpu.dma_semaphore, #tpu.memory_space<semaphore_mem>>)
    } else {
    }
    %c1_i32_5 = arith.constant 1 : i32
    %14 = arith.addi %arg1, %c1_i32_5 : i32
    %c2_i32_6 = arith.constant 2 : i32
    %15 = arith.cmpi slt, %14, %c2_i32_6 : i32
    %16 = arith.extui %15 : i1 to i32
    %c0_i32_7 = arith.constant 0 : i32
    %17 = arith.cmpi ne, %16, %c0_i32_7 : i32
    scf.if %17 {
      %c1_i32_23 = arith.constant 1 : i32
      %40 = arith.addi %arg1, %c1_i32_23 : i32
      %c1_i32_24 = arith.constant 1 : i32
      %41 = arith.subi %c1_i32_24, %10 : i32
      %c0_i32_25 = arith.constant 0 : i32
      %42 = arith.addi %0, %c0_i32_25 : i32
      %43 = arith.index_cast %40 : i32 to index
      %44 = arith.index_cast %42 : i32 to index
      %45 = memref.load %arg2[%43, %44] : memref<2x8xi32, #tpu.memory_space<smem>>
      %c0_i32_26 = arith.constant 0 : i32
      %c0_i32_27 = arith.constant 0 : i32
      %46 = tpu.memref_slice %arg6[%45, %c0_i32_27] : memref<64x128xf32, #tpu.memory_space<any>> -> memref<1x128xf32, #tpu.memory_space<any>>
      %47 = tpu.memref_squeeze %46 : memref<1x128xf32, #tpu.memory_space<any>> -> memref<128xf32, #tpu.memory_space<any>>
      %c0_i32_28 = arith.constant 0 : i32
      %48 = tpu.memref_slice %arg8[%41, %c0_i32_26, %c0_i32_28] : memref<2x8x128xf32, #tpu.memory_space<vmem>> -> memref<1x1x128xf32, #tpu.memory_space<vmem>>
      %49 = tpu.memref_squeeze %48 : memref<1x1x128xf32, #tpu.memory_space<vmem>> -> memref<128xf32, #tpu.memory_space<vmem>>
      %50 = tpu.memref_slice %arg9[%41] : memref<2x!tpu.dma_semaphore, #tpu.memory_space<semaphore_mem>> -> memref<1x!tpu.dma_semaphore, #tpu.memory_space<semaphore_mem>>
      %51 = tpu.memref_squeeze %50 : memref<1x!tpu.dma_semaphore, #tpu.memory_space<semaphore_mem>> -> memref<!tpu.dma_semaphore, #tpu.memory_space<semaphore_mem>>
      tpu.enqueue_dma source(%47 : memref<128xf32, #tpu.memory_space<any>>) target(%49 : memref<128xf32, #tpu.memory_space<vmem>>) target_semaphore(%51 : memref<!tpu.dma_semaphore, #tpu.memory_space<semaphore_mem>>)
      %c1_i32_29 = arith.constant 1 : i32
      %52 = arith.addi %0, %c1_i32_29 : i32
      %53 = arith.index_cast %40 : i32 to index
      %54 = arith.index_cast %52 : i32 to index
      %55 = memref.load %arg2[%53, %54] : memref<2x8xi32, #tpu.memory_space<smem>>
      %c1_i32_30 = arith.constant 1 : i32
      %c0_i32_31 = arith.constant 0 : i32
      %56 = tpu.memref_slice %arg6[%55, %c0_i32_31] : memref<64x128xf32, #tpu.memory_space<any>> -> memref<1x128xf32, #tpu.memory_space<any>>
      %57 = tpu.memref_squeeze %56 : memref<1x128xf32, #tpu.memory_space<any>> -> memref<128xf32, #tpu.memory_space<any>>
      %c0_i32_32 = arith.constant 0 : i32
      %58 = tpu.memref_slice %arg8[%41, %c1_i32_30, %c0_i32_32] : memref<2x8x128xf32, #tpu.memory_space<vmem>> -> memref<1x1x128xf32, #tpu.memory_space<vmem>>
      %59 = tpu.memref_squeeze %58 : memref<1x1x128xf32, #tpu.memory_space<vmem>> -> memref<128xf32, #tpu.memory_space<vmem>>
      %60 = tpu.memref_slice %arg9[%41] : memref<2x!tpu.dma_semaphore, #tpu.memory_space<semaphore_mem>> -> memref<1x!tpu.dma_semaphore, #tpu.memory_space<semaphore_mem>>
      %61 = tpu.memref_squeeze %60 : memref<1x!tpu.dma_semaphore, #tpu.memory_space<semaphore_mem>> -> memref<!tpu.dma_semaphore, #tpu.memory_space<semaphore_mem>>
      tpu.enqueue_dma source(%57 : memref<128xf32, #tpu.memory_space<any>>) target(%59 : memref<128xf32, #tpu.memory_space<vmem>>) target_semaphore(%61 : memref<!tpu.dma_semaphore, #tpu.memory_space<semaphore_mem>>)
      %c2_i32_33 = arith.constant 2 : i32
      %62 = arith.addi %0, %c2_i32_33 : i32
      %63 = arith.index_cast %40 : i32 to index
      %64 = arith.index_cast %62 : i32 to index
      %65 = memref.load %arg2[%63, %64] : memref<2x8xi32, #tpu.memory_space<smem>>
      %c2_i32_34 = arith.constant 2 : i32
      %c0_i32_35 = arith.constant 0 : i32
      %66 = tpu.memref_slice %arg6[%65, %c0_i32_35] : memref<64x128xf32, #tpu.memory_space<any>> -> memref<1x128xf32, #tpu.memory_space<any>>
      %67 = tpu.memref_squeeze %66 : memref<1x128xf32, #tpu.memory_space<any>> -> memref<128xf32, #tpu.memory_space<any>>
      %c0_i32_36 = arith.constant 0 : i32
      %68 = tpu.memref_slice %arg8[%41, %c2_i32_34, %c0_i32_36] : memref<2x8x128xf32, #tpu.memory_space<vmem>> -> memref<1x1x128xf32, #tpu.memory_space<vmem>>
      %69 = tpu.memref_squeeze %68 : memref<1x1x128xf32, #tpu.memory_space<vmem>> -> memref<128xf32, #tpu.memory_space<vmem>>
      %70 = tpu.memref_slice %arg9[%41] : memref<2x!tpu.dma_semaphore, #tpu.memory_space<semaphore_mem>> -> memref<1x!tpu.dma_semaphore, #tpu.memory_space<semaphore_mem>>
      %71 = tpu.memref_squeeze %70 : memref<1x!tpu.dma_semaphore, #tpu.memory_space<semaphore_mem>> -> memref<!tpu.dma_semaphore, #tpu.memory_space<semaphore_mem>>
      tpu.enqueue_dma source(%67 : memref<128xf32, #tpu.memory_space<any>>) target(%69 : memref<128xf32, #tpu.memory_space<vmem>>) target_semaphore(%71 : memref<!tpu.dma_semaphore, #tpu.memory_space<semaphore_mem>>)
      %c3_i32 = arith.constant 3 : i32
      %72 = arith.addi %0, %c3_i32 : i32
      %73 = arith.index_cast %40 : i32 to index
      %74 = arith.index_cast %72 : i32 to index
      %75 = memref.load %arg2[%73, %74] : memref<2x8xi32, #tpu.memory_space<smem>>
      %c3_i32_37 = arith.constant 3 : i32
      %c0_i32_38 = arith.constant 0 : i32
      %76 = tpu.memref_slice %arg6[%75, %c0_i32_38] : memref<64x128xf32, #tpu.memory_space<any>> -> memref<1x128xf32, #tpu.memory_space<any>>
      %77 = tpu.memref_squeeze %76 : memref<1x128xf32, #tpu.memory_space<any>> -> memref<128xf32, #tpu.memory_space<any>>
      %c0_i32_39 = arith.constant 0 : i32
      %78 = tpu.memref_slice %arg8[%41, %c3_i32_37, %c0_i32_39] : memref<2x8x128xf32, #tpu.memory_space<vmem>> -> memref<1x1x128xf32, #tpu.memory_space<vmem>>
      %79 = tpu.memref_squeeze %78 : memref<1x1x128xf32, #tpu.memory_space<vmem>> -> memref<128xf32, #tpu.memory_space<vmem>>
      %80 = tpu.memref_slice %arg9[%41] : memref<2x!tpu.dma_semaphore, #tpu.memory_space<semaphore_mem>> -> memref<1x!tpu.dma_semaphore, #tpu.memory_space<semaphore_mem>>
      %81 = tpu.memref_squeeze %80 : memref<1x!tpu.dma_semaphore, #tpu.memory_space<semaphore_mem>> -> memref<!tpu.dma_semaphore, #tpu.memory_space<semaphore_mem>>
      tpu.enqueue_dma source(%77 : memref<128xf32, #tpu.memory_space<any>>) target(%79 : memref<128xf32, #tpu.memory_space<vmem>>) target_semaphore(%81 : memref<!tpu.dma_semaphore, #tpu.memory_space<semaphore_mem>>)
      %c4_i32 = arith.constant 4 : i32
      %82 = arith.addi %0, %c4_i32 : i32
      %83 = arith.index_cast %40 : i32 to index
      %84 = arith.index_cast %82 : i32 to index
      %85 = memref.load %arg2[%83, %84] : memref<2x8xi32, #tpu.memory_space<smem>>
      %c4_i32_40 = arith.constant 4 : i32
      %c0_i32_41 = arith.constant 0 : i32
      %86 = tpu.memref_slice %arg6[%85, %c0_i32_41] : memref<64x128xf32, #tpu.memory_space<any>> -> memref<1x128xf32, #tpu.memory_space<any>>
      %87 = tpu.memref_squeeze %86 : memref<1x128xf32, #tpu.memory_space<any>> -> memref<128xf32, #tpu.memory_space<any>>
      %c0_i32_42 = arith.constant 0 : i32
      %88 = tpu.memref_slice %arg8[%41, %c4_i32_40, %c0_i32_42] : memref<2x8x128xf32, #tpu.memory_space<vmem>> -> memref<1x1x128xf32, #tpu.memory_space<vmem>>
      %89 = tpu.memref_squeeze %88 : memref<1x1x128xf32, #tpu.memory_space<vmem>> -> memref<128xf32, #tpu.memory_space<vmem>>
      %90 = tpu.memref_slice %arg9[%41] : memref<2x!tpu.dma_semaphore, #tpu.memory_space<semaphore_mem>> -> memref<1x!tpu.dma_semaphore, #tpu.memory_space<semaphore_mem>>
      %91 = tpu.memref_squeeze %90 : memref<1x!tpu.dma_semaphore, #tpu.memory_space<semaphore_mem>> -> memref<!tpu.dma_semaphore, #tpu.memory_space<semaphore_mem>>
      tpu.enqueue_dma source(%87 : memref<128xf32, #tpu.memory_space<any>>) target(%89 : memref<128xf32, #tpu.memory_space<vmem>>) target_semaphore(%91 : memref<!tpu.dma_semaphore, #tpu.memory_space<semaphore_mem>>)
      %c5_i32 = arith.constant 5 : i32
      %92 = arith.addi %0, %c5_i32 : i32
      %93 = arith.index_cast %40 : i32 to index
      %94 = arith.index_cast %92 : i32 to index
      %95 = memref.load %arg2[%93, %94] : memref<2x8xi32, #tpu.memory_space<smem>>
      %c5_i32_43 = arith.constant 5 : i32
      %c0_i32_44 = arith.constant 0 : i32
      %96 = tpu.memref_slice %arg6[%95, %c0_i32_44] : memref<64x128xf32, #tpu.memory_space<any>> -> memref<1x128xf32, #tpu.memory_space<any>>
      %97 = tpu.memref_squeeze %96 : memref<1x128xf32, #tpu.memory_space<any>> -> memref<128xf32, #tpu.memory_space<any>>
      %c0_i32_45 = arith.constant 0 : i32
      %98 = tpu.memref_slice %arg8[%41, %c5_i32_43, %c0_i32_45] : memref<2x8x128xf32, #tpu.memory_space<vmem>> -> memref<1x1x128xf32, #tpu.memory_space<vmem>>
      %99 = tpu.memref_squeeze %98 : memref<1x1x128xf32, #tpu.memory_space<vmem>> -> memref<128xf32, #tpu.memory_space<vmem>>
      %100 = tpu.memref_slice %arg9[%41] : memref<2x!tpu.dma_semaphore, #tpu.memory_space<semaphore_mem>> -> memref<1x!tpu.dma_semaphore, #tpu.memory_space<semaphore_mem>>
      %101 = tpu.memref_squeeze %100 : memref<1x!tpu.dma_semaphore, #tpu.memory_space<semaphore_mem>> -> memref<!tpu.dma_semaphore, #tpu.memory_space<semaphore_mem>>
      tpu.enqueue_dma source(%97 : memref<128xf32, #tpu.memory_space<any>>) target(%99 : memref<128xf32, #tpu.memory_space<vmem>>) target_semaphore(%101 : memref<!tpu.dma_semaphore, #tpu.memory_space<semaphore_mem>>)
      %c6_i32 = arith.constant 6 : i32
      %102 = arith.addi %0, %c6_i32 : i32
      %103 = arith.index_cast %40 : i32 to index
      %104 = arith.index_cast %102 : i32 to index
      %105 = memref.load %arg2[%103, %104] : memref<2x8xi32, #tpu.memory_space<smem>>
      %c6_i32_46 = arith.constant 6 : i32
      %c0_i32_47 = arith.constant 0 : i32
      %106 = tpu.memref_slice %arg6[%105, %c0_i32_47] : memref<64x128xf32, #tpu.memory_space<any>> -> memref<1x128xf32, #tpu.memory_space<any>>
      %107 = tpu.memref_squeeze %106 : memref<1x128xf32, #tpu.memory_space<any>> -> memref<128xf32, #tpu.memory_space<any>>
      %c0_i32_48 = arith.constant 0 : i32
      %108 = tpu.memref_slice %arg8[%41, %c6_i32_46, %c0_i32_48] : memref<2x8x128xf32, #tpu.memory_space<vmem>> -> memref<1x1x128xf32, #tpu.memory_space<vmem>>
      %109 = tpu.memref_squeeze %108 : memref<1x1x128xf32, #tpu.memory_space<vmem>> -> memref<128xf32, #tpu.memory_space<vmem>>
      %110 = tpu.memref_slice %arg9[%41] : memref<2x!tpu.dma_semaphore, #tpu.memory_space<semaphore_mem>> -> memref<1x!tpu.dma_semaphore, #tpu.memory_space<semaphore_mem>>
      %111 = tpu.memref_squeeze %110 : memref<1x!tpu.dma_semaphore, #tpu.memory_space<semaphore_mem>> -> memref<!tpu.dma_semaphore, #tpu.memory_space<semaphore_mem>>
      tpu.enqueue_dma source(%107 : memref<128xf32, #tpu.memory_space<any>>) target(%109 : memref<128xf32, #tpu.memory_space<vmem>>) target_semaphore(%111 : memref<!tpu.dma_semaphore, #tpu.memory_space<semaphore_mem>>)
      %c7_i32 = arith.constant 7 : i32
      %112 = arith.addi %0, %c7_i32 : i32
      %113 = arith.index_cast %40 : i32 to index
      %114 = arith.index_cast %112 : i32 to index
      %115 = memref.load %arg2[%113, %114] : memref<2x8xi32, #tpu.memory_space<smem>>
      %c7_i32_49 = arith.constant 7 : i32
      %c0_i32_50 = arith.constant 0 : i32
      %116 = tpu.memref_slice %arg6[%115, %c0_i32_50] : memref<64x128xf32, #tpu.memory_space<any>> -> memref<1x128xf32, #tpu.memory_space<any>>
      %117 = tpu.memref_squeeze %116 : memref<1x128xf32, #tpu.memory_space<any>> -> memref<128xf32, #tpu.memory_space<any>>
      %c0_i32_51 = arith.constant 0 : i32
      %118 = tpu.memref_slice %arg8[%41, %c7_i32_49, %c0_i32_51] : memref<2x8x128xf32, #tpu.memory_space<vmem>> -> memref<1x1x128xf32, #tpu.memory_space<vmem>>
      %119 = tpu.memref_squeeze %118 : memref<1x1x128xf32, #tpu.memory_space<vmem>> -> memref<128xf32, #tpu.memory_space<vmem>>
      %120 = tpu.memref_slice %arg9[%41] : memref<2x!tpu.dma_semaphore, #tpu.memory_space<semaphore_mem>> -> memref<1x!tpu.dma_semaphore, #tpu.memory_space<semaphore_mem>>
      %121 = tpu.memref_squeeze %120 : memref<1x!tpu.dma_semaphore, #tpu.memory_space<semaphore_mem>> -> memref<!tpu.dma_semaphore, #tpu.memory_space<semaphore_mem>>
      tpu.enqueue_dma source(%117 : memref<128xf32, #tpu.memory_space<any>>) target(%119 : memref<128xf32, #tpu.memory_space<vmem>>) target_semaphore(%121 : memref<!tpu.dma_semaphore, #tpu.memory_space<semaphore_mem>>)
    } else {
    }
    %c0_i32_8 = arith.constant 0 : i32
    %c0_i32_9 = arith.constant 0 : i32
    %18 = tpu.memref_slice %arg6[%c0_i32_8, %c0_i32_9] : memref<64x128xf32, #tpu.memory_space<any>> -> memref<8x128xf32, #tpu.memory_space<any>>
    %c0_i32_10 = arith.constant 0 : i32
    %c0_i32_11 = arith.constant 0 : i32
    %19 = tpu.memref_slice %arg8[%10, %c0_i32_10, %c0_i32_11] : memref<2x8x128xf32, #tpu.memory_space<vmem>> -> memref<1x8x128xf32, #tpu.memory_space<vmem>>
    %20 = tpu.memref_squeeze %19 : memref<1x8x128xf32, #tpu.memory_space<vmem>> -> memref<8x128xf32, #tpu.memory_space<vmem>>
    %21 = tpu.memref_slice %arg9[%10] : memref<2x!tpu.dma_semaphore, #tpu.memory_space<semaphore_mem>> -> memref<1x!tpu.dma_semaphore, #tpu.memory_space<semaphore_mem>>
    %22 = tpu.memref_squeeze %21 : memref<1x!tpu.dma_semaphore, #tpu.memory_space<semaphore_mem>> -> memref<!tpu.dma_semaphore, #tpu.memory_space<semaphore_mem>>
    tpu.wait_dma2 semaphore(%22 : memref<!tpu.dma_semaphore, #tpu.memory_space<semaphore_mem>>) src(%18 : memref<8x128xf32, #tpu.memory_space<any>>) dst(%20 : memref<8x128xf32, #tpu.memory_space<vmem>>)
    %c0 = arith.constant 0 : index
    %c0_12 = arith.constant 0 : index
    %c0_13 = arith.constant 0 : index
    %23 = vector.load %arg4[%c0, %c0_12, %c0_13] : memref<1x8x24xi32, #tpu.memory_space<vmem>>, vector<1x8x24xi32>
    %24 = vector.shape_cast %23 : vector<1x8x24xi32> to vector<8x24xi32>
    %25 = tpu.iota {dimensions = array<i32: 1>} : vector<8x24xi32>
    %26 = arith.cmpi eq, %24, %25 : vector<8x24xi32>
    %27 = arith.extui %26 : vector<8x24xi1> to vector<8x24xi32>
    %28 = arith.sitofp %27 : vector<8x24xi32> to vector<8x24xf32>
    %c0_14 = arith.constant 0 : index
    %c0_15 = arith.constant 0 : index
    %29 = vector.load %arg5[%c0_14, %c0_15] : memref<24x128xf32, #tpu.memory_space<vmem>>, vector<24x128xf32>
    %cst = arith.constant dense<0.000000e+00> : vector<8x128xf32>
    %30 = tpu.matmul %28, %29, %cst {dimension_numbers = #tpu.dot_dimension_numbers<[1], [0], [0], [1], [0, 0, 1, 1], [], []>} : vector<8x24xf32>, vector<24x128xf32>, vector<8x128xf32> -> vector<8x128xf32>
    %31 = arith.index_cast %10 : i32 to index
    %c0_16 = arith.constant 0 : index
    %c0_17 = arith.constant 0 : index
    %32 = vector.load %arg8[%31, %c0_16, %c0_17] : memref<2x8x128xf32, #tpu.memory_space<vmem>>, vector<1x8x128xf32>
    %33 = vector.shape_cast %32 : vector<1x8x128xf32> to vector<8x128xf32>
    %34 = arith.addf %33, %30 : vector<8x128xf32>
    %c0_18 = arith.constant 0 : index
    %c0_19 = arith.constant 0 : index
    %35 = vector.load %arg3[%c0_18, %c0_19] : memref<8x128xf32, #tpu.memory_space<vmem>>, vector<8x128xf32>
    %36 = arith.addf %34, %35 : vector<8x128xf32>
    %c0_20 = arith.constant 0 : index
    %c0_21 = arith.constant 0 : index
    %c0_22 = arith.constant 0 : index
    %37 = vector.load %arg7[%c0_20, %c0_21, %c0_22] : memref<1x8x128xf32, #tpu.memory_space<vmem>>, vector<1x8x128xf32>
    %38 = vector.shape_cast %37 : vector<1x8x128xf32> to vector<8x128xf32>
    %39 = vector.shape_cast %36 : vector<8x128xf32> to vector<1x8x128xf32>
    tpu.vector_store %arg7[%c0_20, %c0_21, %c0_22], %39 {strides = array<i32>} : memref<1x8x128xf32, #tpu.memory_space<vmem>>, vector<1x8x128xf32>,
    return
  }
  func.func @transform_0(%arg0: i32, %arg1: i32, %arg2: memref<2x8xi32, #tpu.memory_space<smem>>) -> (i32, i32) {
    %c0_i32 = arith.constant 0 : i32
    %c0_i32_0 = arith.constant 0 : i32
    return %arg0, %c0_i32 : i32, i32
  }
  func.func @transform_1(%arg0: i32, %arg1: i32, %arg2: memref<2x8xi32, #tpu.memory_space<smem>>) -> (i32, i32, i32) {
    %c0_i32 = arith.constant 0 : i32
    %c0_i32_0 = arith.constant 0 : i32
    return %arg1, %arg0, %c0_i32 : i32, i32, i32
  }
  func.func @transform_2(%arg0: i32, %arg1: i32, %arg2: memref<2x8xi32, #tpu.memory_space<smem>>) -> (i32, i32) {
    %c0_i32 = arith.constant 0 : i32
    %c0_i32_0 = arith.constant 0 : i32
    %c0_i32_1 = arith.constant 0 : i32
    return %c0_i32, %c0_i32_0 : i32, i32
  }
  func.func @transform_4(%arg0: i32, %arg1: i32, %arg2: memref<2x8xi32, #tpu.memory_space<smem>>) -> (i32, i32, i32) {
    %c0_i32 = arith.constant 0 : i32
    %c0_i32_0 = arith.constant 0 : i32
    return %arg1, %arg0, %c0_i32 : i32, i32, i32
  }
}

</mosaic_0001>

<bundles_post_ra>
// kernel: tpu_custom_call.1
= control target key start
LH: loop header
LB: loop body
LE: loop exit
PB: predicated region body
PF: predicated region fallthrough
CT: control target
= control target key end

     0   :  { %s1673_s21 = smov [#allocation5]   ;;  %s2272_s0 = inlined_call_operand.hbm [shape: s32[2,8], index: 0, kind: input, shape index: {}]   ;;  %s2273_s1 = inlined_call_operand.hbm [shape: f32[4096,128], index: 1, kind: input, shape index: {}]   ;;  %s2274_s2 = inlined_call_operand.hbm [shape: s32[2,8,24], index: 2, kind: input, shape index: {}]   ;;  %s2275_s3 = inlined_call_operand.hbm [shape: f32[24,128], index: 3, kind: input, shape index: {}]   ;;  %s2276_s4 = inlined_call_operand.hbm [shape: f32[64,128], index: 4, kind: input, shape index: {}]   ;;  %s2277_s5 = inlined_call_operand.hbm [shape: f32[2,8,128], index: 5, kind: output, shape index: {}]  }
   0x1   :  { %2294 = sst [smem:[#allocation66_spill]] %s2273_s1  ;;  %s11_s20 = sshll.u32 %s2272_s0, 4  ;;  %s12_s20 = int_to_ptr.hbm [resolvable:$true] %s11_s20 }
   0x2   :  { %2295 = sst [smem:[#allocation67_spill]] %s2274_s2 }
   0x3   :  { %2296 = sst [smem:[#allocation68_spill]] %s2275_s3 }
   0x4   :  { %14 = dma.hbm_to_smem %s12_s20, 32, %s1673_s21, [#allocation4] }
   0x5   :  { %1629 = dma.done.wait [#allocation4], 32 }
   0x6   :  { %1630 = vsyncadd [#allocation4], 4294967264 }
   0x7   :  { %17 = sfence }
   0x8   :  { %18 = vsyncpa [#allocation7], 0 }
   0x9   :  { %19 = vsyncpa [#allocation10], 0 }
   0xa   :  { %21 = vsyncpa [#allocation10 + $0x1], 0 }
   0xb   :  { %22 = vsyncpa [#allocation8], 0 }
   0xc   :  { %24 = vsyncpa [#allocation8 + $0x1], 0  ;;  %s1720_s22 = smov 0   ;;  %s1722_s23 = smov 0  }
   0xd   :  { %s1724_s24 = smov 0   ;;  %s1726_s25 = smov 0  }
   0xe   :  { %s1728_s0 = smov 0   ;;  %s1730_s26 = smov 0  }
   0xf LB: > { %2297 = sst [smem:[#allocation61_spill]] %s1667_s0  ;;  %s1754_s30 = sadd.s32 4294967295, %s1671_s26   ;;  %s1671_s26 = sphi %s1730_s26, %s30_s26   ;;  %s1667_s0 = sphi %s1728_s0, %s2343_s0   ;;  %s1663_s25 = sphi %s1726_s25, %s2342_s25   ;;  %s1659_s24 = sphi %s1724_s24, %s2346_s24   ;;  %s1655_s23 = sphi %s1722_s23, %s2345_s23   ;;  %s1651_s22 = sphi %s1720_s22, %s2344_s22  }
  0x10   : > { %s2298_s3 = sld [smem:[#allocation68_spill]]  ;;  %p832_p0 = scmp.ge.s32.totalorder %s1671_s26, 1 }
  0x11   : > { %p91_p1 = scmp.eq.s32.totalorder %s1754_s30, 0  ;;  %p137_p2 = scmp.eq.s32.totalorder %s1754_s30, 1 }
  0x12   : > { %p150_p3 = scmp.lt.s32.totalorder %s1671_s26, 3  ;;  %s1674_s7 = smov [#allocation11]  }
  0x13   : > { %s177_s8 = sshll.u32 %s1674_s7, 4  ;;  %s2300_s1 = sld [smem:[#allocation66_spill]]  ;;  %s178_s8 = int_to_ptr.vmem [resolvable:$true] %s177_s8 }
  0x14   : > { %p1760_p4 = pnand %p832_p0, %p150_p3  ;;  %s1675_s12 = smov [#allocation6]  }
  0x15   : > { %s166_s13 = sshll.u32 %s1675_s12, 4  ;;  %s1676_s14 = smov 128   ;;  %s167_s13 = int_to_ptr.vmem [resolvable:$true] %s166_s13 }
  0x16   : > { %s175_s29 = sshll.u32 %s2298_s3, 4  ;;  %p942_p5 = pneg %p1760_p4  ;;  %s176_s29 = int_to_ptr.hbm [resolvable:$true] %s175_s29 }
  0x17   : > { %s1677_s15 = smov 8   ;;  %s831_s16 = sadd.s32 4294967294, %s1671_s26  }
  0x18   : > { %p943_p7 = pnand %p942_p5, %p91_p1  ;;  %s39_s17 = sadd.s32 1, %s1667_s0 }
  0x19   : > { %s164_s11 = sshll.u32 %s2300_s1, 4  ;;  %s77_s18 = sadd.s32 1, %s1659_s24  ;;  %s165_s11 = int_to_ptr.hbm [resolvable:$true] %s164_s11 }
  0x1a   : > { %948 = dma.hbm_to_vmem [thread:$0]  (!%p943_p7), %s176_s29, 384, %s178_s8, [#allocation10], %s1676_s14, %s1676_s14, %s1677_s15  }
  0x1b   : > { %945 = dma.hbm_to_vmem [thread:$0]  (!%p943_p7), %s165_s11, 128, %s167_s13, [#allocation7]  }
  0x1c   : > { %p40_p8 = scmp.ge.s32.totalorder %s39_s17, 2  ;;  %p84_p9 = scmp.ne.s32.totalorder %s1659_s24, %s1655_s23 }
  0x1d   : > { %p85_p10 = scmp.eq.s32.totalorder %s1671_s26, 0  ;;  %p90_p11 = scmp.ne.s32.totalorder %s1655_s23, %s1651_s22 }
  0x1e   : > { %s2348_s17 = smov (%p40_p8, %s39_s17), 0  ;;  %p1796_p0 = por %p137_p2, %p84_p9 }
  0x1f   : > { %2301 = sst [smem:[#allocation62_spill]] %s2348_s17  ;;  %p1782_p12 = por %p85_p10, %p84_p9 }
  0x20   : > { %p1788_p13 = por %p91_p1, %p90_p11  ;;  %s72_s21 = ssub.s32 %s1667_s0, %s2348_s17 }
  0x21   : > { %p75_p3 = scmp.eq.s32.totalorder %s72_s21, 0  ;;  %p143_p5 = scmp.eq.s32.totalorder %s831_s16, 1 }
  0x22   : > { %p959_p7 = scmp.lt.s32.totalorder %s1671_s26, 2  ;;  %s191_s28 = sand.u32 1, %s1671_s26  }
  0x23   : > { %s1803_s29 = scalar_select %p75_p3, %s1659_s24, %s77_s18  }
  0x24   : > { %p1805_p8 = por %p143_p5, %p90_p11  ;;  %s193_s8 = sand.u32 1, %s1659_s24  }
  0x25   : > { %2305 = sst [smem:[#allocation63_spill]] %s1803_s29  ;;  %s837_s9 = sshll.u32 %s1667_s0, 3 }
  0x26   : > { %s2306_s7 = scalar_select %p1805_p8, 1, 0 }
  0x27   : > { %s836_s10 = sshll.u32 %s193_s8, 3  ;;  %s2307_s2 = sld [smem:[#allocation67_spill]] }
  0x28   : > { %s195_s15 = scalar_lea.vmem [#allocation9], %s836_s10  ;;  %p950_p2 = pnand %p959_p7, %p1782_p12 }
  0x29   : > { %s204_s21 = sshll.u32 %s195_s15, 4  ;;  %s192_s16 = scalar_lea.sflag [#allocation10], %s191_s28  ;;  %s205_s21 = int_to_ptr.vmem [resolvable:$true] %s204_s21 }
  0x2b   : > { %213 = sbr.rel (%p1760_p4) target bundleno = 580 (0x244), region = 32 }
  0x2d   : > { %s200_s13 = scalar_lea.hbm %s2307_s2, %s837_s9 }
  0x2e   : > { %s202_s14 = sshll.u32 %s200_s13, 4  ;;  %s203_s14 = int_to_ptr.hbm [resolvable:$true] %s202_s14 }
  0x2f   : > { %952 = dma.hbm_to_vmem [thread:$0]  (!%p950_p2), %s203_s14, 128, %s205_s21, %s192_s16  }
  0x30   : > { %1632 = dma.done.wait (%p91_p1), [#allocation7], 128  }
  0x31   : > { %1634 = vsyncadd (%p91_p1), [#allocation7], 4294967168  ;;  %s220_s18 = sand.u32 1, %s1754_s30   ;;  %s2278_s8 = sand.u32 1, %s1655_s23  }
  0x32   : > { %s1828_s19 = sshll.u32 %s2278_s8, 3  ;;  %s221_s28 = scalar_lea.sflag [#allocation10], %s220_s18 }
  0x33   : > { %1636 = dma.done.wait (%p1788_p13), %s221_s28, 128  }
  0x34   : > { %1638 = vsyncadd (%p1788_p13), %s221_s28, 4294967168 }
  0x35   : > { %1640 = dma.done.wait (%p91_p1), [#allocation10], 384  }
  0x36   : > { %1642 = vsyncadd (%p91_p1), [#allocation10], 4294966912  ;;  %p962_p4 = scmp.eq.s32.totalorder %s1663_s25, 0  ;;  %s270_s6 = sld [smem:[#allocation5]] }
  0x37   : > { %s847_s10 = sld [smem:[#allocation5 + $0x1]]  ;;  %s2279_s11 = smov [#allocation2]  }
  0x38   : > { %s281_s12 = sshll.u32 %s2279_s11, 4  ;;  %s1679_s13 = smov [#allocation2 + $0x1]   ;;  %s282_s12 = int_to_ptr.vmem [resolvable:$true] %s281_s12 }
  0x39   : > { %s1841_s14 = sshll.u32 %s1679_s13, 4  ;;  %s1844_s20 = sld [smem:[#allocation5 + $0x2]] }
  0x3a   : > { %2308 = sst [smem:[#allocation64_spill]] %s1841_s14  ;;  %s1680_s18 = smov [#allocation2 + $0x2]  }
  0x3b   : > { %s1846_s15 = sld [smem:[#allocation5 + $0x3]]  ;;  %s1851_s28 = sshll.u32 %s1680_s18, 4  ;;  %s316_s28 = int_to_ptr.vmem [resolvable:$true] %s1851_s28 }
  0x3c   : > { %s271_s16 = scalar_lea.hbm %s2276_s4, %s270_s6  ;;  %s1861_s6 = scalar_lea.hbm %s2276_s4, 64 }
  0x3d   : > { %s279_s8 = sshll.u32 %s271_s16, 4  ;;  %s287_s1 = scalar_lea.hbm %s2276_s4, %s847_s10  ;;  %s280_s8 = int_to_ptr.hbm [resolvable:$true] %s279_s8 }
  0x3e   : > { %s296_s13 = sshll.u32 %s287_s1, 4  ;;  %s1129_s2 = sshra.s32 %s280_s8, 4  ;;  %s1130_s2 = int_to_ptr.hbm [resolvable:$true] %s1129_s2  ;;  %s297_s13 = int_to_ptr.hbm [resolvable:$true] %s296_s13 }
  0x3f   : > { %s1131_s14 = scalar_lea.hbm %s1130_s2, 1  ;;  %p1136_p11 = scmp.lt.s32.totalorder %s1130_s2, %s2276_s4 }
  0x40   : > { %p1132_p1 = scmp.ne.s32.totalorder %s1130_s2, %s1131_s14  ;;  %p1137_p12 = scmp.lt.s32.totalorder %s1861_s6, %s1131_s14 }
  0x42   : > { %p1133_p9 = pnand %p1132_p1, %p962_p4  ;;  %p1138_p13 = por %p1137_p12, %p1136_p11 }
  0x44   : > { %p1134_p10 = pneg %p1133_p9 }
  0x46   : > { %p1139_p3 = pnand %p1138_p13, %p1134_p10 }
  0x48   : > { %1142 = shalt.err (!%p1139_p3)  }
  0x49   : > { %907 = dma.hbm_to_vmem [thread:$0]  (%p962_p4), %s280_s8, 16, %s282_s12, [#allocation3] }
  0x4a   : > { %s304_s9 = scalar_lea.hbm %s2276_s4, %s1844_s20  ;;  %s1157_s10 = sshra.s32 %s297_s13, 4  ;;  %s1158_s10 = int_to_ptr.hbm [resolvable:$true] %s1157_s10 }
  0x4b   : > { %s1159_s11 = scalar_lea.hbm %s1158_s10, 1  ;;  %p1164_p1 = scmp.lt.s32.totalorder %s1158_s10, %s2276_s4 }
  0x4c   : > { %p1160_p5 = scmp.ne.s32.totalorder %s1158_s10, %s1159_s11  ;;  %p1165_p9 = scmp.lt.s32.totalorder %s1861_s6, %s1159_s11 }
  0x4e   : > { %p1161_p7 = pnand %p1160_p5, %p962_p4  ;;  %p1166_p10 = por %p1165_p9, %p1164_p1 }
  0x50   : > { %p1162_p2 = pneg %p1161_p7 }
  0x52   : > { %p1167_p11 = pnand %p1166_p10, %p1162_p2 }
  0x54   : > { %1170 = shalt.err (!%p1167_p11)  }
  0x55   : > { %s2309_s8 = sld [smem:[#allocation64_spill]]  ;;  %s313_s20 = sshll.u32 %s304_s9, 4  ;;  %s314_s20 = int_to_ptr.hbm [resolvable:$true] %s313_s20 }
  0x56   : > { %s321_s21 = scalar_lea.hbm %s2276_s4, %s1846_s15  ;;  %s1185_s16 = sshra.s32 %s314_s20, 4  ;;  %s1186_s16 = int_to_ptr.hbm [resolvable:$true] %s1185_s16 }
  0x57   : > { %s1187_s1 = scalar_lea.hbm %s1186_s16, 1  ;;  %p1192_p5 = scmp.lt.s32.totalorder %s1186_s16, %s2276_s4 }
  0x58   : > { %p1188_p12 = scmp.ne.s32.totalorder %s1186_s16, %s1187_s1  ;;  %p1193_p7 = scmp.lt.s32.totalorder %s1861_s6, %s1187_s1 }
  0x5a   : > { %p1189_p13 = pnand %p1188_p12, %p962_p4  ;;  %p1194_p2 = por %p1193_p7, %p1192_p5 }
  0x5b   : > { %s2310_s12 = int_to_ptr.vmem [resolvable:$true] %s2309_s8 }
  0x5c   : > { %908 = dma.hbm_to_vmem [thread:$0]  (%p962_p4), %s297_s13, 16, %s2310_s12, [#allocation3] }
  0x5d   : > { %p1190_p3 = pneg %p1189_p13 }
  0x5f   : > { %p1195_p1 = pnand %p1194_p2, %p1190_p3 }
  0x61   : > { %1198 = shalt.err (!%p1195_p1)  }
  0x62   : > { %909 = dma.hbm_to_vmem [thread:$0]  (%p962_p4), %s314_s20, 16, %s316_s28, [#allocation3] }
  0x63   : > { %s330_s15 = sshll.u32 %s321_s21, 4  ;;  %s1681_s13 = smov [#allocation2 + $0x3]   ;;  %s331_s15 = int_to_ptr.hbm [resolvable:$true] %s330_s15 }
  0x64   : > { %s332_s9 = sshll.u32 %s1681_s13, 4  ;;  %s850_s11 = sld [smem:[#allocation5 + $0x4]]  ;;  %s333_s9 = int_to_ptr.vmem [resolvable:$true] %s332_s9 }
  0x65   : > { %s1213_s2 = sshra.s32 %s331_s15, 4  ;;  %s1214_s2 = int_to_ptr.hbm [resolvable:$true] %s1213_s2 }
  0x66   : > { %s1215_s14 = scalar_lea.hbm %s1214_s2, 1  ;;  %p1220_p12 = scmp.lt.s32.totalorder %s1214_s2, %s2276_s4 }
  0x67   : > { %p1216_p9 = scmp.ne.s32.totalorder %s1214_s2, %s1215_s14  ;;  %p1221_p13 = scmp.lt.s32.totalorder %s1861_s6, %s1215_s14 }
  0x69   : > { %p1217_p10 = pnand %p1216_p9, %p962_p4  ;;  %p1222_p3 = por %p1221_p13, %p1220_p12 }
  0x6b   : > { %p1218_p11 = pneg %p1217_p10 }
  0x6d   : > { %p1223_p5 = pnand %p1222_p3, %p1218_p11 }
  0x6f   : > { %1226 = shalt.err (!%p1223_p5)  }
  0x70   : > { %910 = dma.hbm_to_vmem [thread:$0]  (%p962_p4), %s331_s15, 16, %s333_s9, [#allocation3] }
  0x71   : > { %s851_s28 = sld [smem:[#allocation5 + $0x5]]  ;;  %s1682_s20 = smov [#allocation2 + $0x4]  }
  0x72   : > { %s349_s18 = sshll.u32 %s1682_s20, 4  ;;  %s1683_s30 = smov [#allocation2 + $0x5]   ;;  %s350_s18 = int_to_ptr.vmem [resolvable:$true] %s349_s18 }
  0x73   : > { %s1904_s21 = sshll.u32 %s1683_s30, 4  ;;  %s1907_s16 = sld [smem:[#allocation5 + $0x6]] }
  0x74   : > { %2311 = sst [smem:[#allocation64_spill]] %s1904_s21  ;;  %s338_s10 = scalar_lea.hbm %s2276_s4, %s850_s11 }
  0x75   : > { %s347_s13 = sshll.u32 %s338_s10, 4  ;;  %s1684_s2 = smov [#allocation2 + $0x6]   ;;  %s348_s13 = int_to_ptr.hbm [resolvable:$true] %s347_s13 }
  0x76   : > { %s1912_s15 = sshll.u32 %s1684_s2, 4  ;;  %s1241_s12 = sshra.s32 %s348_s13, 4  ;;  %s1242_s12 = int_to_ptr.hbm [resolvable:$true] %s1241_s12  ;;  %s384_s15 = int_to_ptr.vmem [resolvable:$true] %s1912_s15 }
  0x77   : > { %s355_s8 = scalar_lea.hbm %s2276_s4, %s851_s28  ;;  %s1243_s20 = scalar_lea.hbm %s1242_s12, 1 }
  0x78   : > { %p1244_p7 = scmp.ne.s32.totalorder %s1242_s12, %s1243_s20  ;;  %p1248_p9 = scmp.lt.s32.totalorder %s1242_s12, %s2276_s4 }
  0x79   : > { %p1249_p10 = scmp.lt.s32.totalorder %s1861_s6, %s1243_s20 }
  0x7a   : > { %p1245_p2 = pnand %p1244_p7, %p962_p4 }
  0x7b   : > { %p1250_p11 = por %p1249_p10, %p1248_p9 }
  0x7c   : > { %p1246_p1 = pneg %p1245_p2 }
  0x7e   : > { %p1251_p12 = pnand %p1250_p11, %p1246_p1 }
  0x80   : > { %1254 = shalt.err (!%p1251_p12)  }
  0x81   : > { %911 = dma.hbm_to_vmem [thread:$0]  (%p962_p4), %s348_s13, 16, %s350_s18, [#allocation3] }
  0x82   : > { %s364_s11 = sshll.u32 %s355_s8, 4  ;;  %s372_s3 = scalar_lea.hbm %s2276_s4, %s1907_s16  ;;  %s365_s11 = int_to_ptr.hbm [resolvable:$true] %s364_s11 }
  0x83   : > { %s1269_s21 = sshra.s32 %s365_s11, 4  ;;  %s1270_s21 = int_to_ptr.hbm [resolvable:$true] %s1269_s21 }
  0x84   : > { %s1271_s10 = scalar_lea.hbm %s1270_s21, 1  ;;  %p1276_p7 = scmp.lt.s32.totalorder %s1270_s21, %s2276_s4 }
  0x85   : > { %p1272_p13 = scmp.ne.s32.totalorder %s1270_s21, %s1271_s10  ;;  %p1277_p2 = scmp.lt.s32.totalorder %s1861_s6, %s1271_s10 }
  0x87   : > { %p1273_p3 = pnand %p1272_p13, %p962_p4  ;;  %p1278_p1 = por %p1277_p2, %p1276_p7 }
  0x89   : > { %p1274_p5 = pneg %p1273_p3 }
  0x8b   : > { %p1279_p9 = pnand %p1278_p1, %p1274_p5 }
  0x8d   : > { %1282 = shalt.err (!%p1279_p9)  }
  0x8e   : > { %s2312_s18 = sld [smem:[#allocation64_spill]]  ;;  %s381_s16 = sshll.u32 %s372_s3, 4  ;;  %s382_s16 = int_to_ptr.hbm [resolvable:$true] %s381_s16 }
  0x8f   : > { %s853_s14 = sld [smem:[#allocation5 + $0x7]]  ;;  %s1297_s8 = sshra.s32 %s382_s16, 4  ;;  %s1298_s8 = int_to_ptr.hbm [resolvable:$true] %s1297_s8 }
  0x90   : > { %s1299_s12 = scalar_lea.hbm %s1298_s8, 1  ;;  %p1304_p13 = scmp.lt.s32.totalorder %s1298_s8, %s2276_s4 }
  0x91   : > { %p1300_p10 = scmp.ne.s32.totalorder %s1298_s8, %s1299_s12  ;;  %p1305_p3 = scmp.lt.s32.totalorder %s1861_s6, %s1299_s12 }
  0x93   : > { %p1301_p11 = pnand %p1300_p10, %p962_p4  ;;  %p1306_p5 = por %p1305_p3, %p1304_p13 }
  0x94   : > { %s2313_s13 = int_to_ptr.vmem [resolvable:$true] %s2312_s18 }
  0x95   : > { %912 = dma.hbm_to_vmem [thread:$0]  (%p962_p4), %s365_s11, 16, %s2313_s13, [#allocation3] }
  0x96   : > { %p1302_p12 = pneg %p1301_p11 }
  0x98   : > { %p1307_p7 = pnand %p1306_p5, %p1302_p12 }
  0x9a   : > { %1310 = shalt.err (!%p1307_p7)  }
  0x9b   : > { %913 = dma.hbm_to_vmem [thread:$0]  (%p962_p4), %s382_s16, 16, %s384_s15, [#allocation3] }
  0x9c   : > { %s1685_s11 = smov [#allocation2 + $0x7]   ;;  %p254_p2 = scmp.lt.s32.totalorder %s1663_s25, 0 }
  0x9d   : > { %s400_s28 = sshll.u32 %s1685_s11, 4  ;;  %s255_s1 = ssub.s32 0, %s1663_s25  ;;  %s401_s28 = int_to_ptr.vmem [resolvable:$true] %s400_s28 }
  0x9e   : > { %s843_s3 = smin.u32 %s1663_s25, %s255_s1  ;;  %s404_s21 = sadd.s32 1, %s1663_s25 }
  0x9f   : > { %s389_s9 = scalar_lea.hbm %s2276_s4, %s853_s14  ;;  %s257_s18 = sand.u32 1, %s843_s3  }
  0xa0   : > { %s398_s13 = sshll.u32 %s389_s9, 4  ;;  %s258_s8 = ssub.s32 0, %s257_s18  ;;  %s399_s13 = int_to_ptr.hbm [resolvable:$true] %s398_s13 }
  0xa1   : > { %s1325_s12 = sshra.s32 %s399_s13, 4  ;;  %s1326_s12 = int_to_ptr.hbm [resolvable:$true] %s1325_s12 }
  0xa2   : > { %s1327_s15 = scalar_lea.hbm %s1326_s12, 1  ;;  %p1332_p11 = scmp.lt.s32.totalorder %s1326_s12, %s2276_s4 }
  0xa3   : > { %p1328_p1 = scmp.ne.s32.totalorder %s1326_s12, %s1327_s15  ;;  %p1333_p12 = scmp.lt.s32.totalorder %s1861_s6, %s1327_s15 }
  0xa5   : > { %p1329_p9 = pnand %p1328_p1, %p962_p4  ;;  %p1334_p13 = por %p1333_p12, %p1332_p11 }
  0xa7   : > { %p1330_p10 = pneg %p1329_p9 }
  0xa9   : > { %p1335_p3 = pnand %p1334_p13, %p1330_p10 }
  0xab   : > { %1338 = shalt.err (!%p1335_p3)  }
  0xac   : > { %914 = dma.hbm_to_vmem [thread:$0]  (%p962_p4), %s399_s13, 16, %s401_s28, [#allocation3] }
  0xad   : > { %s2350_s8 = smov (!%p254_p2, %s258_s8), %s257_s18  ;;  %p1967_p5 = scmp.lt.s32.totalorder %s404_s21, 2 }
  0xae   : > { %s880_s30 = sshll.u32 %s1663_s25, 7  ;;  %p845_p7 = scmp.lt.s32.totalorder %s2350_s8, 0 }
  0xaf   : > { %s264_s11 = sadd.s32 2, %s2350_s8  ;;  %s1972_s1 = sadd.s32 128, %s880_s30 }
  0xb0   : > { %s2352_s11 = smov (!%p845_p7, %s264_s11), %s2350_s8  ;;  %s442_s8 = sadd.s32 1, %s1972_s1 }
  0xb1   : > { %s916_s28 = scalar_select %p1967_p5, [#allocation5], [#allocation47] }
  0xb2   : > { %s409_s3 = ssub.s32 1, %s2352_s11  ;;  %s2354_s8 = smov (!%p1967_p5, %s442_s8), 0 }
  0xb3   : > { %s917_s10 = scalar_select %p1967_p5, %s1972_s1, 0 }
  0xb4   : > { %s856_s2 = sshll.u32 %s409_s3, 3  ;;  %s2005_s21 = scalar_lea.sflag [#allocation3], %s409_s3 }
  0xb5   : > { %s417_s9 = sld [smem:[%s916_s28 + %s917_s10]]  ;;  %s1983_s18 = scalar_lea.vmem [#allocation2], %s856_s2 }
  0xb6   : > { %s431_s13 = sshll.u32 %s1983_s18, 4  ;;  %s743_s12 = scalar_lea.vmem %s1983_s18, 1 [#allocation2]  ;;  %s1986_s13 = int_to_ptr.vmem [resolvable:$true] %s431_s13 }
  0xb7   : > { %s919_s15 = scalar_select %p1967_p5, [#allocation5], [#allocation48] }
  0xb8   : > { %s1997_s28 = sshll.u32 %s743_s12, 4 }
  0xb9   : > { %2315 = sst [smem:[#allocation64_spill]] %s1997_s28 }
  0xba   : > { %s2001_s2 = sld [smem:[%s919_s15 + %s2354_s8]] }
  0xbb   : > { %s418_s30 = scalar_lea.hbm %s2276_s4, %s417_s9 }
  0xbc   : > { %s1999_s10 = sshll.u32 %s418_s30, 4  ;;  %s430_s10 = int_to_ptr.hbm [resolvable:$true] %s1999_s10 }
  0xbd   : > { %s1353_s17 = sshra.s32 %s430_s10, 4  ;;  %s1354_s17 = int_to_ptr.hbm [resolvable:$true] %s1353_s17 }
  0xbe   : > { %s1355_s0 = scalar_lea.hbm %s1354_s17, 1  ;;  %p1360_p9 = scmp.lt.s32.totalorder %s1354_s17, %s2276_s4 }
  0xbf   : > { %p1356_p4 = scmp.ne.s32.totalorder %s1354_s17, %s1355_s0  ;;  %p1361_p10 = scmp.lt.s32.totalorder %s1861_s6, %s1355_s0 }
  0xc1   : > { %p1357_p2 = pnand %p1356_p4, %p1967_p5  ;;  %p1362_p11 = por %p1361_p10, %p1360_p9 }
  0xc3   : > { %p1358_p1 = pneg %p1357_p2 }
  0xc5   : > { %p1363_p12 = pnand %p1362_p11, %p1358_p1 }
  0xc7   : > { %1366 = shalt.err (!%p1363_p12)  }
  0xc8   : > { %s1367_s8 = sshra.s32 %s1986_s13, 4  ;;  %s2316_s15 = smov [#allocation2]   ;;  %s1368_s8 = int_to_ptr.vmem [resolvable:$true] %s1367_s8 }
  0xc9   : > { %s1369_s3 = scalar_lea.vmem %s1368_s8, 1  ;;  %s2017_s16 = scalar_lea.vmem %s2316_s15, 16 }
  0xca   : > { %p1370_p13 = scmp.ne.s32.totalorder %s1368_s8, %s1369_s3  ;;  %p1374_p4 = scmp.lt.s32.totalorder %s1368_s8, [#allocation2] }
  0xcb   : > { %p1375_p2 = scmp.lt.s32.totalorder %s2017_s16, %s1369_s3 }
  0xcc   : > { %p1371_p3 = pnand %p1370_p13, %p1967_p5 }
  0xcd   : > { %p1376_p6 = por %p1375_p2, %p1374_p4 }
  0xce   : > { %p1372_p7 = pneg %p1371_p3 }
  0xd0   : > { %p1377_p8 = pnand %p1376_p6, %p1372_p7 }
  0xd2   : > { %1380 = shalt.err (!%p1377_p8)  }
  0xd3   : > { %918 = dma.hbm_to_vmem [thread:$0]  (%p1967_p5), %s430_s10, 16, %s1986_s13, %s2005_s21 }
  0xd4   : > { %s467_s0 = sadd.s32 2, %s1972_s1  ;;  %s747_s17 = scalar_lea.vmem %s1983_s18, 2 [#allocation2] }
  0xd5   : > { %s922_s20 = scalar_select %p1967_p5, [#allocation5], [#allocation49] }
  0xd6   : > { %s2356_s0 = smov (!%p1967_p5, %s467_s0), 0  ;;  %s444_s12 = scalar_lea.hbm %s2276_s4, %s2001_s2 }
  0xd7   : > { %s2034_s8 = sshll.u32 %s747_s17, 4  ;;  %s454_s3 = sshll.u32 %s444_s12, 4  ;;  %s455_s3 = int_to_ptr.hbm [resolvable:$true] %s454_s3 }
  0xd8   : > { %2317 = sst [smem:[#allocation65_spill]] %s2034_s8  ;;  %s1381_s13 = sshra.s32 %s455_s3, 4  ;;  %s1382_s13 = int_to_ptr.hbm [resolvable:$true] %s1381_s13 }
  0xd9   : > { %s2036_s15 = sld [smem:[%s922_s20 + %s2356_s0]]  ;;  %s1383_s10 = scalar_lea.hbm %s1382_s13, 1 }
  0xda   : > { %p1384_p6 = scmp.ne.s32.totalorder %s1382_s13, %s1383_s10  ;;  %p1388_p9 = scmp.lt.s32.totalorder %s1382_s13, %s2276_s4 }
  0xdb   : > { %p1389_p10 = scmp.lt.s32.totalorder %s1861_s6, %s1383_s10 }
  0xdc   : > { %p1385_p8 = pnand %p1384_p6, %p1967_p5 }
  0xdd   : > { %p1390_p11 = por %p1389_p10, %p1388_p9 }
  0xde   : > { %p1386_p1 = pneg %p1385_p8 }
  0xe0   : > { %p1391_p12 = pnand %p1390_p11, %p1386_p1 }
  0xe2   : > { %1394 = shalt.err (!%p1391_p12)  }
  0xe3   : > { %s2318_s2 = sld [smem:[#allocation64_spill]] }
  0xe9   : > { %s2319_s0 = int_to_ptr.vmem [resolvable:$true] %s2318_s2 }
  0xea   : > { %s1395_s17 = sshra.s32 %s2319_s0, 4  ;;  %s1396_s17 = int_to_ptr.vmem [resolvable:$true] %s1395_s17 }
  0xeb   : > { %s1397_s20 = scalar_lea.vmem %s1396_s17, 1  ;;  %p1402_p4 = scmp.lt.s32.totalorder %s1396_s17, [#allocation2] }
  0xec   : > { %p1398_p13 = scmp.ne.s32.totalorder %s1396_s17, %s1397_s20  ;;  %p1403_p2 = scmp.lt.s32.totalorder %s2017_s16, %s1397_s20 }
  0xee   : > { %p1399_p3 = pnand %p1398_p13, %p1967_p5  ;;  %p1404_p6 = por %p1403_p2, %p1402_p4 }
  0xf0   : > { %p1400_p7 = pneg %p1399_p3 }
  0xf2   : > { %p1405_p8 = pnand %p1404_p6, %p1400_p7 }
  0xf4   : > { %1408 = shalt.err (!%p1405_p8)  }
  0xf5   : > { %s2320_s29 = smov %s2319_s0  ;;  %s492_s28 = sadd.s32 3, %s1972_s1 }
  0xf6   : > { %921 = dma.hbm_to_vmem [thread:$0]  (%p1967_p5), %s455_s3, 16, %s2320_s29, %s2005_s21 }
  0xf7   : > { %s751_s30 = scalar_lea.vmem %s1983_s18, 3 [#allocation2]  ;;  %s2358_s28 = smov (!%p1967_p5, %s492_s28), 0 }
  0xf8   : > { %s925_s9 = scalar_select %p1967_p5, [#allocation5], [#allocation50] }
  0xf9   : > { %s469_s10 = scalar_lea.hbm %s2276_s4, %s2036_s15  ;;  %s2065_s0 = sshll.u32 %s751_s30, 4 }
  0xfa   : > { %2321 = sst [smem:[#allocation64_spill]] %s2065_s0  ;;  %s479_s2 = sshll.u32 %s469_s10, 4  ;;  %s480_s2 = int_to_ptr.hbm [resolvable:$true] %s479_s2 }
  0xfb   : > { %s2067_s17 = sld [smem:[%s925_s9 + %s2358_s28]]  ;;  %s1409_s3 = sshra.s32 %s480_s2, 4  ;;  %s1410_s3 = int_to_ptr.hbm [resolvable:$true] %s1409_s3 }
  0xfc   : > { %s1411_s20 = scalar_lea.hbm %s1410_s3, 1  ;;  %p1416_p11 = scmp.lt.s32.totalorder %s1410_s3, %s2276_s4 }
  0xfd   : > { %p1412_p1 = scmp.ne.s32.totalorder %s1410_s3, %s1411_s20  ;;  %p1417_p12 = scmp.lt.s32.totalorder %s1861_s6, %s1411_s20 }
  0xff   : > { %p1413_p9 = pnand %p1412_p1, %p1967_p5  ;;  %p1418_p13 = por %p1417_p12, %p1416_p11 }
 0x101   : > { %p1414_p10 = pneg %p1413_p9 }
 0x103   : > { %p1419_p3 = pnand %p1418_p13, %p1414_p10 }
 0x105   : > { %1422 = shalt.err (!%p1419_p3)  }
 0x106   : > { %s2322_s15 = sld [smem:[#allocation65_spill]] }
 0x10c   : > { %s2323_s28 = int_to_ptr.vmem [resolvable:$true] %s2322_s15 }
 0x10d   : > { %s1423_s30 = sshra.s32 %s2323_s28, 4  ;;  %s1424_s30 = int_to_ptr.vmem [resolvable:$true] %s1423_s30 }
 0x10e   : > { %s1425_s9 = scalar_lea.vmem %s1424_s30, 1  ;;  %p1430_p6 = scmp.lt.s32.totalorder %s1424_s30, [#allocation2] }
 0x10f   : > { %p1426_p7 = scmp.ne.s32.totalorder %s1424_s30, %s1425_s9  ;;  %p1431_p8 = scmp.lt.s32.totalorder %s2017_s16, %s1425_s9 }
 0x111   : > { %p1427_p4 = pnand %p1426_p7, %p1967_p5  ;;  %p1432_p1 = por %p1431_p8, %p1430_p6 }
 0x113   : > { %p1428_p2 = pneg %p1427_p4 }
 0x115   : > { %p1433_p9 = pnand %p1432_p1, %p1428_p2 }
 0x117   : > { %1436 = shalt.err (!%p1433_p9)  }
 0x118   : > { %s2324_s8 = smov %s2323_s28  ;;  %s517_s12 = sadd.s32 4, %s1972_s1 }
 0x119   : > { %924 = dma.hbm_to_vmem [thread:$0]  (%p1967_p5), %s480_s2, 16, %s2324_s8, %s2005_s21 }
 0x11a   : > { %s755_s13 = scalar_lea.vmem %s1983_s18, 4 [#allocation2]  ;;  %s2360_s12 = smov (!%p1967_p5, %s517_s12), 0 }
 0x11b   : > { %s928_s10 = scalar_select %p1967_p5, [#allocation5], [#allocation51] }
 0x11c   : > { %s494_s29 = scalar_lea.hbm %s2276_s4, %s2067_s17  ;;  %s2096_s28 = sshll.u32 %s755_s13, 4 }
 0x11d   : > { %2325 = sst [smem:[#allocation65_spill]] %s2096_s28  ;;  %s504_s15 = sshll.u32 %s494_s29, 4  ;;  %s505_s15 = int_to_ptr.hbm [resolvable:$true] %s504_s15 }
 0x11e   : > { %s2098_s30 = sld [smem:[%s928_s10 + %s2360_s12]]  ;;  %s1437_s2 = sshra.s32 %s505_s15, 4  ;;  %s1438_s2 = int_to_ptr.hbm [resolvable:$true] %s1437_s2 }
 0x11f   : > { %s1439_s9 = scalar_lea.hbm %s1438_s2, 1  ;;  %p1444_p13 = scmp.lt.s32.totalorder %s1438_s2, %s2276_s4 }
 0x120   : > { %p1440_p10 = scmp.ne.s32.totalorder %s1438_s2, %s1439_s9  ;;  %p1445_p3 = scmp.lt.s32.totalorder %s1861_s6, %s1439_s9 }
 0x122   : > { %p1441_p11 = pnand %p1440_p10, %p1967_p5  ;;  %p1446_p7 = por %p1445_p3, %p1444_p13 }
 0x124   : > { %p1442_p12 = pneg %p1441_p11 }
 0x126   : > { %p1447_p4 = pnand %p1446_p7, %p1442_p12 }
 0x128   : > { %1450 = shalt.err (!%p1447_p4)  }
 0x129   : > { %s2326_s17 = sld [smem:[#allocation64_spill]] }
 0x12f   : > { %s2327_s12 = int_to_ptr.vmem [resolvable:$true] %s2326_s17 }
 0x130   : > { %s1451_s13 = sshra.s32 %s2327_s12, 4  ;;  %s1452_s13 = int_to_ptr.vmem [resolvable:$true] %s1451_s13 }
 0x131   : > { %s1453_s10 = scalar_lea.vmem %s1452_s13, 1  ;;  %p1458_p1 = scmp.lt.s32.totalorder %s1452_s13, [#allocation2] }
 0x132   : > { %p1454_p2 = scmp.ne.s32.totalorder %s1452_s13, %s1453_s10  ;;  %p1459_p9 = scmp.lt.s32.totalorder %s2017_s16, %s1453_s10 }
 0x134   : > { %p1455_p6 = pnand %p1454_p2, %p1967_p5  ;;  %p1460_p10 = por %p1459_p9, %p1458_p1 }
 0x136   : > { %p1456_p8 = pneg %p1455_p6 }
 0x138   : > { %p1461_p11 = pnand %p1460_p10, %p1456_p8 }
 0x13a   : > { %1464 = shalt.err (!%p1461_p11)  }
 0x13b   : > { %s2328_s0 = smov %s2327_s12  ;;  %s542_s3 = sadd.s32 5, %s1972_s1 }
 0x13c   : > { %927 = dma.hbm_to_vmem [thread:$0]  (%p1967_p5), %s505_s15, 16, %s2328_s0, %s2005_s21 }
 0x13d   : > { %s759_s20 = scalar_lea.vmem %s1983_s18, 5 [#allocation2]  ;;  %s2362_s3 = smov (!%p1967_p5, %s542_s3), 0 }
 0x13e   : > { %s931_s29 = scalar_select %p1967_p5, [#allocation5], [#allocation52] }
 0x13f   : > { %s519_s8 = scalar_lea.hbm %s2276_s4, %s2098_s30  ;;  %s2127_s12 = sshll.u32 %s759_s20, 4 }
 0x140   : > { %2329 = sst [smem:[#allocation64_spill]] %s2127_s12  ;;  %s529_s17 = sshll.u32 %s519_s8, 4  ;;  %s530_s17 = int_to_ptr.hbm [resolvable:$true] %s529_s17 }
 0x141   : > { %s2129_s13 = sld [smem:[%s931_s29 + %s2362_s3]]  ;;  %s1465_s15 = sshra.s32 %s530_s17, 4  ;;  %s1466_s15 = int_to_ptr.hbm [resolvable:$true] %s1465_s15 }
 0x142   : > { %s1467_s10 = scalar_lea.hbm %s1466_s15, 1  ;;  %p1472_p7 = scmp.lt.s32.totalorder %s1466_s15, %s2276_s4 }
 0x143   : > { %p1468_p12 = scmp.ne.s32.totalorder %s1466_s15, %s1467_s10  ;;  %p1473_p4 = scmp.lt.s32.totalorder %s1861_s6, %s1467_s10 }
 0x145   : > { %p1469_p13 = pnand %p1468_p12, %p1967_p5  ;;  %p1474_p2 = por %p1473_p4, %p1472_p7 }
 0x147   : > { %p1470_p3 = pneg %p1469_p13 }
 0x149   : > { %p1475_p6 = pnand %p1474_p2, %p1470_p3 }
 0x14b   : > { %1478 = shalt.err (!%p1475_p6)  }
 0x14c   : > { %s2330_s30 = sld [smem:[#allocation65_spill]] }
 0x152   : > { %s2331_s3 = int_to_ptr.vmem [resolvable:$true] %s2330_s30 }
 0x153   : > { %s1479_s20 = sshra.s32 %s2331_s3, 4  ;;  %s1480_s20 = int_to_ptr.vmem [resolvable:$true] %s1479_s20 }
 0x154   : > { %s1481_s29 = scalar_lea.vmem %s1480_s20, 1  ;;  %p1486_p10 = scmp.lt.s32.totalorder %s1480_s20, [#allocation2] }
 0x155   : > { %p1482_p8 = scmp.ne.s32.totalorder %s1480_s20, %s1481_s29  ;;  %p1487_p11 = scmp.lt.s32.totalorder %s2017_s16, %s1481_s29 }
 0x157   : > { %p1483_p1 = pnand %p1482_p8, %p1967_p5  ;;  %p1488_p12 = por %p1487_p11, %p1486_p10 }
 0x159   : > { %p1484_p9 = pneg %p1483_p1 }
 0x15b   : > { %p1489_p13 = pnand %p1488_p12, %p1484_p9 }
 0x15d   : > { %1492 = shalt.err (!%p1489_p13)  }
 0x15e   : > { %s2332_s28 = smov %s2331_s3  ;;  %s567_s2 = sadd.s32 6, %s1972_s1 }
 0x15f   : > { %930 = dma.hbm_to_vmem [thread:$0]  (%p1967_p5), %s530_s17, 16, %s2332_s28, %s2005_s21 }
 0x160   : > { %s763_s9 = scalar_lea.vmem %s1983_s18, 6 [#allocation2]  ;;  %s2364_s2 = smov (!%p1967_p5, %s567_s2), 0 }
 0x161   : > { %s934_s8 = scalar_select %p1967_p5, [#allocation5], [#allocation53] }
 0x162   : > { %s544_s0 = scalar_lea.hbm %s2276_s4, %s2129_s13  ;;  %s2158_s3 = sshll.u32 %s763_s9, 4  ;;  %s582_s3 = int_to_ptr.vmem [resolvable:$true] %s2158_s3 }
 0x163   : > { %s554_s30 = sshll.u32 %s544_s0, 4  ;;  %s2160_s20 = sld [smem:[%s934_s8 + %s2364_s2]]  ;;  %s555_s30 = int_to_ptr.hbm [resolvable:$true] %s554_s30 }
 0x164   : > { %s1493_s29 = sshra.s32 %s555_s30, 4  ;;  %s1494_s29 = int_to_ptr.hbm [resolvable:$true] %s1493_s29 }
 0x165   : > { %s1495_s17 = scalar_lea.hbm %s1494_s29, 1  ;;  %p1500_p2 = scmp.lt.s32.totalorder %s1494_s29, %s2276_s4 }
 0x166   : > { %p1496_p3 = scmp.ne.s32.totalorder %s1494_s29, %s1495_s17  ;;  %p1501_p6 = scmp.lt.s32.totalorder %s1861_s6, %s1495_s17 }
 0x168   : > { %p1497_p7 = pnand %p1496_p3, %p1967_p5  ;;  %p1502_p8 = por %p1501_p6, %p1500_p2 }
 0x16a   : > { %p1498_p4 = pneg %p1497_p7 }
 0x16c   : > { %p1503_p1 = pnand %p1502_p8, %p1498_p4 }
 0x16e   : > { %1506 = shalt.err (!%p1503_p1)  }
 0x16f   : > { %s2333_s13 = sld [smem:[#allocation64_spill]] }
 0x175   : > { %s2334_s9 = int_to_ptr.vmem [resolvable:$true] %s2333_s13 }
 0x176   : > { %s1507_s2 = sshra.s32 %s2334_s9, 4  ;;  %s1508_s2 = int_to_ptr.vmem [resolvable:$true] %s1507_s2 }
 0x177   : > { %s1509_s8 = scalar_lea.vmem %s1508_s2, 1  ;;  %p1514_p12 = scmp.lt.s32.totalorder %s1508_s2, [#allocation2] }
 0x178   : > { %p1510_p9 = scmp.ne.s32.totalorder %s1508_s2, %s1509_s8  ;;  %p1515_p13 = scmp.lt.s32.totalorder %s2017_s16, %s1509_s8 }
 0x17a   : > { %p1511_p10 = pnand %p1510_p9, %p1967_p5  ;;  %p1516_p3 = por %p1515_p13, %p1514_p12 }
 0x17c   : > { %p1512_p11 = pneg %p1511_p10 }
 0x17e   : > { %p1517_p7 = pnand %p1516_p3, %p1512_p11 }
 0x180   : > { %1520 = shalt.err (!%p1517_p7)  }
 0x181   : > { %s2335_s12 = smov %s2334_s9  ;;  %s592_s15 = sadd.s32 7, %s1972_s1 }
 0x182   : > { %933 = dma.hbm_to_vmem [thread:$0]  (%p1967_p5), %s555_s30, 16, %s2335_s12, %s2005_s21 }
 0x183   : > { %s937_s10 = scalar_select %p1967_p5, [#allocation5], [#allocation54] }
 0x184   : > { %s2366_s15 = smov (!%p1967_p5, %s592_s15), 0  ;;  %s569_s17 = scalar_lea.hbm %s2276_s4, %s2160_s20 }
 0x185   : > { %s767_s28 = scalar_lea.vmem %s1983_s18, 7 [#allocation2]  ;;  %s579_s13 = sshll.u32 %s569_s17, 4  ;;  %s580_s13 = int_to_ptr.hbm [resolvable:$true] %s579_s13 }
 0x186   : > { %s593_s9 = sld [smem:[%s937_s10 + %s2366_s15]]  ;;  %s1521_s2 = sshra.s32 %s580_s13, 4  ;;  %s1522_s2 = int_to_ptr.hbm [resolvable:$true] %s1521_s2 }
 0x187   : > { %s1523_s8 = scalar_lea.hbm %s1522_s2, 1  ;;  %p1528_p8 = scmp.lt.s32.totalorder %s1522_s2, %s2276_s4 }
 0x188   : > { %p1524_p4 = scmp.ne.s32.totalorder %s1522_s2, %s1523_s8  ;;  %p1529_p1 = scmp.lt.s32.totalorder %s1861_s6, %s1523_s8 }
 0x18a   : > { %p1525_p2 = pnand %p1524_p4, %p1967_p5  ;;  %p1530_p9 = por %p1529_p1, %p1528_p8 }
 0x18c   : > { %p1526_p6 = pneg %p1525_p2 }
 0x18e   : > { %p1531_p10 = pnand %p1530_p9, %p1526_p6 }
 0x190   : > { %1534 = shalt.err (!%p1531_p10)  }
 0x191   : > { %s1535_s18 = sshra.s32 %s582_s3, 4  ;;  %s1536_s18 = int_to_ptr.vmem [resolvable:$true] %s1535_s18 }
 0x192   : > { %s1537_s20 = scalar_lea.vmem %s1536_s18, 1  ;;  %p1542_p3 = scmp.lt.s32.totalorder %s1536_s18, [#allocation2] }
 0x193   : > { %p1538_p11 = scmp.ne.s32.totalorder %s1536_s18, %s1537_s20  ;;  %p1543_p7 = scmp.lt.s32.totalorder %s2017_s16, %s1537_s20 }
 0x195   : > { %p1539_p12 = pnand %p1538_p11, %p1967_p5  ;;  %p1544_p4 = por %p1543_p7, %p1542_p3 }
 0x197   : > { %p1540_p13 = pneg %p1539_p12 }
 0x199   : > { %p1545_p2 = pnand %p1544_p4, %p1540_p13 }
 0x19b   : > { %1548 = shalt.err (!%p1545_p2)  }
 0x19c   : > { %936 = dma.hbm_to_vmem [thread:$0]  (%p1967_p5), %s580_s13, 16, %s582_s3, %s2005_s21 }
 0x19d   : > { %s2205_s12 = sshll.u32 %s767_s28, 4  ;;  %s594_s0 = scalar_lea.hbm %s2276_s4, %s593_s9  ;;  %s607_s12 = int_to_ptr.vmem [resolvable:$true] %s2205_s12 }
 0x19e   : > { %s604_s29 = sshll.u32 %s594_s0, 4  ;;  %s605_s29 = int_to_ptr.hbm [resolvable:$true] %s604_s29 }
 0x19f   : > { %s1549_s17 = sshra.s32 %s605_s29, 4  ;;  %s1550_s17 = int_to_ptr.hbm [resolvable:$true] %s1549_s17 }
 0x1a0   : > { %s1551_s2 = scalar_lea.hbm %s1550_s17, 1  ;;  %p1556_p9 = scmp.lt.s32.totalorder %s1550_s17, %s2276_s4 }
 0x1a1   : > { %p1552_p6 = scmp.ne.s32.totalorder %s1550_s17, %s1551_s2  ;;  %p1557_p10 = scmp.lt.s32.totalorder %s1861_s6, %s1551_s2 }
 0x1a3   : > { %p1553_p8 = pnand %p1552_p6, %p1967_p5  ;;  %p1558_p11 = por %p1557_p10, %p1556_p9 }
 0x1a5   : > { %p1554_p1 = pneg %p1553_p8 }
 0x1a7   : > { %p1559_p12 = pnand %p1558_p11, %p1554_p1 }
 0x1a9   : > { %1562 = shalt.err (!%p1559_p12)  }
 0x1aa   : > { %s1563_s3 = sshra.s32 %s607_s12, 4  ;;  %s1564_s3 = int_to_ptr.vmem [resolvable:$true] %s1563_s3 }
 0x1ab   : > { %s1565_s28 = scalar_lea.vmem %s1564_s3, 1  ;;  %p1570_p4 = scmp.lt.s32.totalorder %s1564_s3, [#allocation2] }
 0x1ac   : > { %p1566_p13 = scmp.ne.s32.totalorder %s1564_s3, %s1565_s28  ;;  %p1571_p2 = scmp.lt.s32.totalorder %s2017_s16, %s1565_s28 }
 0x1ae   : > { %p1567_p3 = pnand %p1566_p13, %p1967_p5  ;;  %p1572_p6 = por %p1571_p2, %p1570_p4 }
 0x1b0   : > { %p1568_p7 = pneg %p1567_p3 }
 0x1b2   : > { %p1573_p8 = pnand %p1572_p6, %p1568_p7 }
 0x1b4   : > { %1576 = shalt.err (!%p1573_p8)  }
 0x1b5   : > { %939 = dma.hbm_to_vmem [thread:$0]  (%p1967_p5), %s605_s29, 16, %s607_s12, %s2005_s21 }
 0x1b6   : > { %s252_s6 = scalar_lea.vmem [#allocation12], %s1828_s19  ;;  %s2336_s13 = sshll.u32 %s2352_s11, 3 }
 0x1b7   : > { %s611_s9 = scalar_lea.vmem [#allocation2], %s2336_s13  ;;  %s612_s30 = scalar_lea.sflag [#allocation3], %s2352_s11 }
 0x1b8   : > { %1643 = dma.done.wait %s612_s30, 128 }
 0x1b9   : > { %1644 = vsyncadd %s612_s30, 4294967168  ;;  %v617_v0 = vlaneseq  ;;  %v624_v2 = vld [vmem:[#allocation11 + $0x10] sm:$0xff]  ;;  %v623_v3 = vld [vmem:[#allocation11 + $0x8] sm:$0xff]  ;;  %s2337_s14 = scalar_lea.vmem [#allocation9], %s1828_s19  ;;  %v1686_v6 = vmov 0.0   ;;  %vm625_vm1 = vcmask 195584  }
 0x1ba   : > { %642 = vmatpush.msra.mxu0 %v624_v2  ;;  %v616_v4 = vld [vmem:[%s2337_s14] sm:$0xff]  ;;  %v622_v5 = vld [vmem:[#allocation11] sm:$0xff]  ;;  %s875_s11 = sshll.u32 %s1663_s25, 3  ;;  %v651_v10 = vld [vmem:[#allocation6] sm:$0xff]  ;;  %s668_s20 = sshll.u32 %s252_s6, 4  ;;  %s669_s20 = int_to_ptr.vmem [resolvable:$true] %s668_s20 }
 0x1bb   : > { %v618_v1 = vand.u32 127, %v617_v0  ;;  %s666_s18 = scalar_lea.hbm %s2277_s5, %s875_s11  ;;  %v649_v8 = vld [vmem:[%s611_s9] sm:$0xff]  ;;  %s2338_s15 = sand.u32 1, %s1655_s23  }
 0x1bc   : > { %643 = vmatpush.msra.mxu0 %v623_v3  ;;  %s670_s12 = sshll.u32 %s666_s18, 4  ;;  %s655_s10 = scalar_lea.sflag [#allocation8], %s2338_s15  ;;  %s671_s12 = int_to_ptr.hbm [resolvable:$true] %s670_s12 }
 0x1bd   : > { %vm619_vm0 = vcmp.eq.s32.totalorder %v616_v4, %v618_v1  ;;  %s1591_s25 = sshra.s32 %s671_s12, 4  ;;  %s1597_s2 = scalar_lea.hbm %s2277_s5, 16  ;;  %s1592_s25 = int_to_ptr.hbm [resolvable:$true] %s1591_s25 }
 0x1be   : > { %v872_v7 = vsel %vm619_vm0, 1.0, %v1686_v6  ;;  %644 = vmatpush.msra.mxu0 %v622_v5  ;;  %s1593_s0 = scalar_lea.hbm %s1592_s25, 8  ;;  %p1598_p10 = scmp.lt.s32.totalorder %s1592_s25, %s2277_s5 }
 0x1bf   : > { %873 = vmatmul.msk.f32.vlgmr.msra.gmra.mxu0 %vm625_vm1, %v872_v7  ;;  %p1594_p5 = scmp.ne.s32.totalorder %s1592_s25, %s1593_s0  ;;  %p1599_p11 = scmp.lt.s32.totalorder %s1597_s2, %s1593_s0 }
 0x1c1   : > { %p1595_p1 = pnand %p1594_p5, %p1796_p0  ;;  %p1600_p12 = por %p1599_p11, %p1598_p10 }
 0x1c3   : > { %p1596_p9 = pneg %p1595_p1 }
 0x1c5   : > { %p1601_p13 = pnand %p1600_p12, %p1596_p9 }
 0x23c   : > { %v646_v9 = vpop.f32.mrf.mxu0 }
 0x23d   : > { %v650_v11 = vadd.f32 %v649_v8, %v646_v9 }
 0x23f   : > { %v652_v12 = vadd.f32 %v651_v10, %v650_v11 }
 0x241   : > { %653 = vst [vmem:[%s252_s6] sm:$0xff] %v652_v12 }
 0x242   : > { %1604 = shalt.err (!%p1601_p13)
}
 0x243   : > { %940 = dma.vmem_to_hbm [thread:$0]  (%p1796_p0), %s669_s20, 128, %s671_s12, %s655_s10  }
 0x244 PF: > { %s682_s19 = sand.u32 1, %s1651_s22   ;;  %p2339_p3 = scmp.ne.s32.totalorder %s2306_s7, 0 }
 0x245   : > { %p2340_p7 = scmp.ge.s32.totalorder %s1671_s26, 2  ;;  %s683_s3 = scalar_lea.sflag [#allocation8], %s682_s19 }
 0x247   : > { %p954_p4 = pnand %p2340_p7, %p2339_p3 }
 0x249   : > { %p955_p2 = pneg %p954_p4 }
 0x24b   : > { %1646 = dma.done.wait (%p955_p2), %s683_s3, 128  }
 0x24c   : > { %1648 = vsyncadd (%p955_p2), %s683_s3, 4294967168  ;;  %s30_s26 = sadd.s32 1, %s1671_s26   ;;  %s2341_s28 = sld [smem:[#allocation63_spill]] }
 0x24d   : > { %p27_p6 = scmp.ge.s32.totalorder %s30_s26, 4   ;;  %s2342_s25 = sld [smem:[#allocation61_spill]] }
 0x24e   : > { %s2343_s0 = sld [smem:[#allocation62_spill]]  ;;  %s2344_s22 = smov %s1655_s23 }
 0x24f   : > { %s2345_s23 = smov %s1659_s24  ;;  %29 = sbr.rel (!%p27_p6) target bundleno = 15 (0xf), region = 194 }
 0x252   : > { %s2346_s24 = smov %s2341_s28 }
 0x254   :  { %689 = vsyncpa [#allocation7], 1 }
 0x255   :  { %691 = vsyncpa [#allocation7 + $0x1], 1 }
 0x256   :  { %692 = vsyncpa [#allocation10], 1 }
 0x257   :  { %694 = vsyncpa [#allocation10 + $0x1], 1 }
 0x258   :  { %695 = vsyncpa [#allocation8], 1 }
 0x259   :  { %697 = vsyncpa [#allocation8 + $0x1], 1 }
 0x25a   :  { %698 = vsyncmov [#allocation3] }
 0x25d   :  { %s699_s27 = vpop.sfrf %698 }
 0x25e   :  { %p878_p0 = scmp.ne.s32.totalorder %s699_s27, 0 }
 0x260   :  { %703 = shalt.err (%p878_p0)  }
 0x261   :  { %705 = vsyncmov [#allocation3 + $0x1] }
 0x264   :  { %s706_s7 = vpop.sfrf %705 }
 0x265   :  { %p879_p8 = scmp.ne.s32.totalorder %s706_s7, 0 }
 0x267   :  { %710 = shalt.err (%p879_p8)  }

</bundles_post_ra>
